<compile_context>
chip_gen: v6e
topology: v6e:2x2x1
jax: 0.10.0
libtpu: 0.0.40
codegen_flags: <defaults>
</compile_context>

<pallas_src>
import functools

import jax
import jax.numpy as jnp
import numpy as np
from jax import lax
from jax.experimental import pallas as pl
from jax.experimental.pallas import tpu as pltpu

N_HEAD = 4
LN_EPS = 1e-5
NEG_INF = -1e30     # large finite negative: robust vs. inf-inf NaNs


def _round_up(x, m):
    return (x + m - 1) // m * m


def _vmem_capacity_bytes():
    try:
        return int(pltpu.get_tpu_info().vmem_capacity_bytes)
    except Exception:
        return 128 * 1024 * 1024          # v5e / v6e default


def _vmem_limit_bytes():
    cap = _vmem_capacity_bytes()
    # ~3/4 of physical VMEM (48 MiB on v7x, 96 MiB on v5e/v6e), capped.
    return int(min(cap * 3 // 4, 100 * 1024 * 1024))


def _pick_shards(batch, seq, *, target_rows):
    """Split M=(B*T) along WHOLE sequences only (attention never mixes
    sequences).  shards stays 1 unless the resident activation block would be
    large — so single-TC v5e/v6e never pay duplicate weight-DMA, while large M
    is bounded for v7x's 64 MiB VMEM and gives megacore a parallel axis."""
    best = 1
    for s in range(1, batch + 1):
        if batch % s:
            continue
        m_s = (batch // s) * seq
        if s > 1 and m_s % 16:            # keep sublane-tile alignment
            continue
        best = s
        if m_s <= target_rows:
            break
    return best


def _pick_row_tile(m, cap=512, mult=16):
    """Largest row tile <= cap that divides m and is a sublane-tile multiple."""
    if m <= cap:
        return m
    t = cap - (cap % mult)
    for c in range(t, mult - 1, -mult):
        if m % c == 0:
            return c
    return m


def _layernorm(x, w, b):
    # PyTorch nn.LayerNorm: biased variance, eps inside sqrt.
    mu = jnp.mean(x, axis=-1, keepdims=True)
    var = jnp.mean(jnp.square(x - mu), axis=-1, keepdims=True)
    return (x - mu) * lax.rsqrt(var + LN_EPS) * w + b


# ----------------------------------------------------------------------------
# Pallas kernels
# ----------------------------------------------------------------------------
def blocks_kernel(x_hbm_ref, lnf_w_ref, lnf_b_ref,
                  ln1_w_ref, ln1_b_ref,
                  wqkv_ref, proj_w_ref, proj_b_ref,
                  ln2_w_ref, ln2_b_ref,
                  ff_w1_ref, ff_b1_ref, ff_w2_ref, ff_b2_ref,
                  xnf_ref, acc_ref, dma_sem, *, bsz, seq, n_head):
    """All transformer Blocks (one layer per grid step) + the final LayerNorm.
    Activations stay resident in the f32 VMEM scratch `acc_ref` for the whole
    layer loop; only the final bf16 ln_f(x) block is written back."""
    p = pl.program_id(0)
    layer = pl.program_id(1)
    n_layers = pl.num_programs(1)
    m_s, E = acc_ref.shape
    hs = E // n_head
    scale = E ** (-0.5)                    # module scales by n_embeddings**-0.5
    bf = jnp.bfloat16

    @pl.when(layer == 0)
    def _load():                            # load activations into VMEM once
        row0 = pl.multiple_of(p * m_s, 8)
        cp = pltpu.make_async_copy(x_hbm_ref.at[pl.ds(row0, m_s), :],
                                   acc_ref, dma_sem.at[0])
        cp.start()
        cp.wait()

    x = acc_ref[...]                        # (m_s, E) f32 resident activations

    # Additive causal mask built on the VPU (no HBM/VMEM mask buffer).
    row = lax.broadcasted_iota(jnp.int32, (seq, seq), 0)
    col = lax.broadcasted_iota(jnp.int32, (seq, seq), 1)
    mask = jnp.where(col <= row, 0.0, NEG_INF).astype(jnp.float32)

    # ---- multi-head causal self-attention on ln1(x) ----
    xn = _layernorm(x, ln1_w_ref[0], ln1_b_ref[0])
    qkv = jnp.dot(xn.astype(bf), wqkv_ref[0],           # fused QKV matmul
                  preferred_element_type=jnp.float32)    # (m_s, 3E) f32

    # TODO(synk): per-head loop kept (single-batch-dim einsums lower robustly
    # in Mosaic); a fused head-batched 'bhtd,bhsd->bhts' einsum would fill the
    # 256x256 MXU better when n_head*hs is large.
    head_outs = []
    for h in range(n_head):                 # static unroll over heads
        qh = qkv[:, h * hs:(h + 1) * hs].reshape(bsz, seq, hs).astype(bf)
        kh = qkv[:, E + h * hs:E + (h + 1) * hs].reshape(bsz, seq, hs).astype(bf)
        vh = qkv[:, 2 * E + h * hs:2 * E + (h + 1) * hs].reshape(bsz, seq, hs).astype(bf)
        wei = jnp.einsum('btd,bsd->bts', qh, kh,          # bf16 MXU, f32 acc
                         preferred_element_type=jnp.float32) * scale + mask
        wei = wei - jnp.max(wei, axis=-1, keepdims=True)  # softmax kept in f32
        wei = jnp.exp(wei)
        wei = wei * pl.reciprocal(jnp.sum(wei, axis=-1, keepdims=True),
                                  approx=True)
        ho = jnp.einsum('bts,bsd->btd', wei.astype(bf), vh,
                        preferred_element_type=jnp.float32)
        head_outs.append(ho.reshape(m_s, hs))
    sa = jnp.concatenate(head_outs, axis=-1)              # (m_s, E) f32
    sa = jnp.dot(sa.astype(bf), proj_w_ref[0],
                 preferred_element_type=jnp.float32) + proj_b_ref[0]
    x = x + sa

    # ---- feed-forward on ln2(x) ----
    xn2 = _layernorm(x, ln2_w_ref[0], ln2_b_ref[0])
    h1 = jnp.dot(xn2.astype(bf), ff_w1_ref[0],
                 preferred_element_type=jnp.float32) + ff_b1_ref[0]
    h1 = jnp.maximum(h1, 0.0).astype(bf)                  # bf16 (m_s, 4E) temp
    ff = jnp.dot(h1, ff_w2_ref[0],
                 preferred_element_type=jnp.float32) + ff_b2_ref[0]
    # TODO(synk): nn.Dropout(0.2) is identity in eval/inference; omitted here.
    x = x + ff
    acc_ref[...] = x

    @pl.when(layer == n_layers - 1)
    def _final():                           # fuse ln_f; emit bf16 for lm_head
        xn_f = _layernorm(x, lnf_w_ref[...], lnf_b_ref[...])
        xnf_ref[...] = xn_f.astype(xnf_ref.dtype)


def lm_head_kernel(xn_ref, lm_w_ref, lm_b_ref, out_ref):
    """One (row-tile, vocab-tile) block of the lm_head projection (bf16 MXU)."""
    out_ref[...] = jnp.dot(xn_ref[...], lm_w_ref[...],
                           preferred_element_type=jnp.float32) + lm_b_ref[...]


# ----------------------------------------------------------------------------
# Wrappers
# ----------------------------------------------------------------------------
def run_blocks(x2, lnf_w, lnf_b, bp, *, batch, seq, n_head):
    """x2: (B*T, E) f32 in HBM.  Returns ln_f(blocks(x)) as bf16 (B*T, E)."""
    M, E = x2.shape
    L = bp["wqkv"].shape[0]

    vmem_cap = _vmem_capacity_bytes()
    target_rows = 1024 if vmem_cap <= (64 << 20) else 4096
    shards = _pick_shards(batch, seq, target_rows=target_rows)
    bsz_s = batch // shards
    m_s = M // shards

    bf = jnp.bfloat16
    weights = [
        bp["ln1_w"], bp["ln1_b"],
        bp["wqkv"].astype(bf),
        bp["proj_w"].astype(bf), bp["proj_b"],
        bp["ln2_w"], bp["ln2_b"],
        bp["ff_w1"].astype(bf), bp["ff_b1"],
        bp["ff_w2"].astype(bf), bp["ff_b2"],
    ]

    def w_spec(arr):   # per-layer weight slab (layer index from grid axis 1)
        return pl.BlockSpec((1,) + arr.shape[1:], lambda p, l: (l, 0, 0))

    in_specs = [pl.BlockSpec(memory_space=pl.ANY),          # x2 stays in HBM
                pl.BlockSpec((1, E), lambda p, l: (0, 0)),  # lnf_w
                pl.BlockSpec((1, E), lambda p, l: (0, 0))]  # lnf_b
    in_specs += [w_spec(w) for w in weights]

    kernel = functools.partial(blocks_kernel, bsz=bsz_s, seq=seq, n_head=n_head)
    return pl.pallas_call(
        kernel,
        out_shape=jax.ShapeDtypeStruct((M, E), jnp.bfloat16),
        grid=(shards, L),
        in_specs=in_specs,
        out_specs=pl.BlockSpec((m_s, E), lambda p, l: (p, 0)),
        scratch_shapes=[pltpu.VMEM((m_s, E), jnp.float32),   # resident activations
                        pltpu.SemaphoreType.DMA((1,))],
        compiler_params=pltpu.CompilerParams(
            dimension_semantics=("parallel", "arbitrary"),
            vmem_limit_bytes=_vmem_limit_bytes()),
    )(x2, lnf_w, lnf_b, *weights)


def run_lm_head(xn_bf16, lm_w, lm_b, *, tile_v=512):
    """xn_bf16: (M, E) bf16 = ln_f(x).  Tiled over (M, vocab); lane-dense tiles."""
    M, E = xn_bf16.shape
    V = lm_w.shape[1]
    tile_v = min(tile_v, _round_up(V, 128))          # lane-dense, 128-multiple
    v_pad = _round_up(V, tile_v)
    if v_pad != V:
        lm_w = jnp.pad(lm_w, ((0, 0), (0, v_pad - V)))
        lm_b = jnp.pad(lm_b, ((0, 0), (0, v_pad - V)))
    lm_w = lm_w.astype(jnp.bfloat16)
    tile_m = _pick_row_tile(M)

    out = pl.pallas_call(
        lm_head_kernel,
        out_shape=jax.ShapeDtypeStruct((M, v_pad), jnp.float32),
        grid=(M // tile_m, v_pad // tile_v),
        in_specs=[pl.BlockSpec((tile_m, E), lambda mi, vi: (mi, 0)),
                  pl.BlockSpec((E, tile_v), lambda mi, vi: (0, vi)),
                  pl.BlockSpec((1, tile_v), lambda mi, vi: (0, vi))],
        out_specs=pl.BlockSpec((tile_m, tile_v), lambda mi, vi: (mi, vi)),
        compiler_params=pltpu.CompilerParams(
            dimension_semantics=("parallel", "arbitrary"),
            vmem_limit_bytes=_vmem_limit_bytes()),
    )(xn_bf16, lm_w, lm_b)
    return out[:, :V]


def julpt_forward(idx, params, *, n_head=N_HEAD, tile_v=512):
    """Forward pass of JulPT (targets=None path): returns (logits (B,T,V), None)."""
    B, T = idx.shape
    E = params["tok_emb"].shape[1]
    tok_emb = jnp.take(params["tok_emb"], idx, axis=0)          # (B, T, E) glue
    pos_emb = params["pos_emb"][:T]                             # (T, E)
    x2 = (tok_emb + pos_emb[None, :, :]).reshape(B * T, E).astype(jnp.float32)
    xnf = run_blocks(x2, params["lnf_w"], params["lnf_b"], params["blocks"],
                     batch=B, seq=T, n_head=n_head)
    logits = run_lm_head(xnf, params["lm_w"], params["lm_b"], tile_v=tile_v)
    return logits.reshape(B, T, -1), None


# ----------------------------------------------------------------------------
# Deterministic parameter init (synthetic; matches shapes of the PyTorch module,
# with per-layer weights stacked on a leading layer axis and QKV fused).
# ----------------------------------------------------------------------------
def init_params(key, vocab_size, context_size, n_emb, n_layers):
    def uni(k, shape, fan_in):
        bound = 1.0 / np.sqrt(fan_in)
        return jax.random.uniform(k, shape, jnp.float32, -bound, bound)

    keys = iter(jax.random.split(key, 4 + 7 * n_layers))
    params = {
        "tok_emb": jax.random.normal(next(keys), (vocab_size, n_emb), jnp.float32),
        "pos_emb": jax.random.normal(next(keys), (context_size, n_emb), jnp.float32),
        "lnf_w": jnp.ones((1, n_emb), jnp.float32),
        "lnf_b": jnp.zeros((1, n_emb), jnp.float32),
        "lm_w": uni(next(keys), (n_emb, vocab_size), n_emb),
        "lm_b": uni(next(keys), (1, vocab_size), n_emb),
    }
    wqkv, proj_w, proj_b = [], [], []
    ff_w1, ff_b1, ff_w2, ff_b2 = [], [], [], []
    for _ in range(n_layers):
        # per-head K/Q/V Linears (bias=False) fused into one (E, 3E) weight:
        # columns [0:E]=Q, [E:2E]=K, [2E:3E]=V, each head contiguous inside.
        wqkv.append(uni(next(keys), (n_emb, 3 * n_emb), n_emb))
        proj_w.append(uni(next(keys), (n_emb, n_emb), n_emb))
        proj_b.append(uni(next(keys), (1, n_emb), n_emb))
        ff_w1.append(uni(next(keys), (n_emb, 4 * n_emb), n_emb))
        ff_b1.append(uni(next(keys), (1, 4 * n_emb), n_emb))
        ff_w2.append(uni(next(keys), (4 * n_emb, n_emb), 4 * n_emb))
        ff_b2.append(uni(next(keys), (1, n_emb), 4 * n_emb))
    L = n_layers
    params["blocks"] = {
        "ln1_w": jnp.ones((L, 1, n_emb), jnp.float32),
        "ln1_b": jnp.zeros((L, 1, n_emb), jnp.float32),
        "wqkv": jnp.stack(wqkv),
        "proj_w": jnp.stack(proj_w),
        "proj_b": jnp.stack(proj_b),
        "ln2_w": jnp.ones((L, 1, n_emb), jnp.float32),
        "ln2_b": jnp.zeros((L, 1, n_emb), jnp.float32),
        "ff_w1": jnp.stack(ff_w1),
        "ff_b1": jnp.stack(ff_b1),
        "ff_w2": jnp.stack(ff_w2),
        "ff_b2": jnp.stack(ff_b2),
    }
    return params


# ----------------------------------------------------------------------------
# Pure-JAX reference with the same bf16-matmul / f32-accumulate mixed precision
# (for tight verification of the Pallas kernels).
# ----------------------------------------------------------------------------
def reference_forward(idx, params, *, n_head=N_HEAD):
    B, T = idx.shape
    E = params["tok_emb"].shape[1]
    hs = E // n_head
    bf = jnp.bfloat16

    def mm(a, w):
        return jnp.dot(a.astype(bf), w.astype(bf),
                       preferred_element_type=jnp.float32)

    x = jnp.take(params["tok_emb"], idx, axis=0) + params["pos_emb"][:T][None]
    causal = jnp.tril(jnp.ones((T, T), bool))
    bp = params["blocks"]
    for l in range(bp["wqkv"].shape[0]):
        xn = _layernorm(x, bp["ln1_w"][l], bp["ln1_b"][l])
        qkv = mm(xn, bp["wqkv"][l])
        q, k, v = qkv[..., :E], qkv[..., E:2 * E], qkv[..., 2 * E:]
        outs = []
        for h in range(n_head):
            qh = q[..., h * hs:(h + 1) * hs].astype(bf)
            kh = k[..., h * hs:(h + 1) * hs].astype(bf)
            vh = v[..., h * hs:(h + 1) * hs].astype(bf)
            wei = jnp.einsum("btd,bsd->bts", qh, kh,
                             preferred_element_type=jnp.float32) * (E ** -0.5)
            wei = jnp.where(causal, wei, -jnp.inf)
            wei = jax.nn.softmax(wei, axis=-1)
            outs.append(jnp.einsum("bts,bsd->btd", wei.astype(bf), vh,
                                   preferred_element_type=jnp.float32))
        sa = mm(jnp.concatenate(outs, axis=-1), bp["proj_w"][l]) + bp["proj_b"][l]
        x = x + sa
        xn2 = _layernorm(x, bp["ln2_w"][l], bp["ln2_b"][l])
        h1 = jnp.maximum(mm(xn2, bp["ff_w1"][l]) + bp["ff_b1"][l], 0.0)
        x = x + mm(h1, bp["ff_w2"][l]) + bp["ff_b2"][l]
    xn = _layernorm(x, params["lnf_w"], params["lnf_b"])
    return mm(xn, params["lm_w"]) + params["lm_b"]


if __name__ == "__main__":
    # Small config: vocab=64, context=8, n_embeddings=32, n_layers=2, n_head=4
    VOCAB, CTX, N_EMB, N_LAYERS = 64, 8, 32, 2
    B, T = 2, 8

    root = jax.random.PRNGKey(0)
    k_params, k_idx = jax.random.split(root)
    params = init_params(k_params, VOCAB, CTX, N_EMB, N_LAYERS)
    idx = jax.random.randint(k_idx, (B, T), 0, VOCAB, dtype=jnp.int32)

    forward = jax.jit(julpt_forward)
    logits, loss = forward(idx, params)
    logits = jax.block_until_ready(logits)
    assert logits.shape == (B, T, VOCAB) and loss is None

    ref = jax.block_until_ready(reference_forward(idx, params))
    np.testing.assert_allclose(np.asarray(logits), np.asarray(ref),
                               rtol=1e-2, atol=1e-2)
    print("KERNEL_OK")
</pallas_src>

<mosaic_0001>
module attributes {stable_mosaic.version = 11 : i64} {
  func.func @lm_head_kernel(%arg0: i32, %arg1: i32, %arg2: memref<16x32xbf16, #tpu.memory_space<vmem>>, %arg3: memref<32x128xbf16, #tpu.memory_space<vmem>>, %arg4: memref<1x128xf32, #tpu.memory_space<vmem>>, %arg5: memref<16x128xf32, #tpu.memory_space<vmem>>) attributes {dimension_semantics = [#tpu.dimension_semantics<parallel>, #tpu.dimension_semantics<arbitrary>], iteration_bounds = array<i64: 1, 1>, scalar_prefetch = 0 : i64, scratch_operands = 0 : i64, tpu.core_type = #tpu.core_type<tc>, window_params = [{transform_indices = @transform_0, window_bounds = array<i64: 16, 32>}, {transform_indices = @transform_1, window_bounds = array<i64: 32, 128>}, {transform_indices = @transform_2, window_bounds = array<i64: 1, 128>}, {transform_indices = @transform_3, window_bounds = array<i64: 16, 128>}]} {
    %c0 = arith.constant 0 : index
    %c0_0 = arith.constant 0 : index
    %0 = vector.load %arg2[%c0, %c0_0] : memref<16x32xbf16, #tpu.memory_space<vmem>>, vector<16x32xbf16>
    %c0_1 = arith.constant 0 : index
    %c0_2 = arith.constant 0 : index
    %1 = vector.load %arg3[%c0_1, %c0_2] : memref<32x128xbf16, #tpu.memory_space<vmem>>, vector<32x128xbf16>
    %cst = arith.constant dense<0.000000e+00> : vector<16x128xf32>
    %2 = tpu.matmul %0, %1, %cst {dimension_numbers = #tpu.dot_dimension_numbers<[1], [0], [0], [1], [0, 0, 1, 1], [], []>} : vector<16x32xbf16>, vector<32x128xbf16>, vector<16x128xf32> -> vector<16x128xf32>
    %c0_3 = arith.constant 0 : index
    %c0_4 = arith.constant 0 : index
    %3 = vector.load %arg4[%c0_3, %c0_4] : memref<1x128xf32, #tpu.memory_space<vmem>>, vector<1x128xf32>
    %4 = vector.broadcast %3 : vector<1x128xf32> to vector<16x128xf32>
    %5 = arith.addf %2, %4 : vector<16x128xf32>
    %c0_5 = arith.constant 0 : index
    %c0_6 = arith.constant 0 : index
    %6 = vector.load %arg5[%c0_5, %c0_6] : memref<16x128xf32, #tpu.memory_space<vmem>>, vector<16x128xf32>
    tpu.vector_store %arg5[%c0_5, %c0_6], %5 {strides = array<i32>} : memref<16x128xf32, #tpu.memory_space<vmem>>, vector<16x128xf32>,
    return
  }
  func.func @transform_0(%arg0: i32, %arg1: i32) -> (i32, i32) {
    %c0_i32 = arith.constant 0 : i32
    %c0_i32_0 = arith.constant 0 : i32
    return %arg0, %c0_i32 : i32, i32
  }
  func.func @transform_1(%arg0: i32, %arg1: i32) -> (i32, i32) {
    %c0_i32 = arith.constant 0 : i32
    %c0_i32_0 = arith.constant 0 : i32
    return %c0_i32, %arg1 : i32, i32
  }
  func.func @transform_2(%arg0: i32, %arg1: i32) -> (i32, i32) {
    %c0_i32 = arith.constant 0 : i32
    %c0_i32_0 = arith.constant 0 : i32
    return %c0_i32, %arg1 : i32, i32
  }
  func.func @transform_3(%arg0: i32, %arg1: i32) -> (i32, i32) {
    %c0_i32 = arith.constant 0 : i32
    return %arg0, %arg1 : i32, i32
  }
}

module attributes {stable_mosaic.version = 11 : i64} {
  func.func @blocks_kernel(%arg0: i32, %arg1: i32, %arg2: memref<16x32xf32, #tpu.memory_space<any>>, %arg3: memref<1x32xf32, #tpu.memory_space<vmem>>, %arg4: memref<1x32xf32, #tpu.memory_space<vmem>>, %arg5: memref<1x1x32xf32, #tpu.memory_space<vmem>>, %arg6: memref<1x1x32xf32, #tpu.memory_space<vmem>>, %arg7: memref<1x32x96xbf16, #tpu.memory_space<vmem>>, %arg8: memref<1x32x32xbf16, #tpu.memory_space<vmem>>, %arg9: memref<1x1x32xf32, #tpu.memory_space<vmem>>, %arg10: memref<1x1x32xf32, #tpu.memory_space<vmem>>, %arg11: memref<1x1x32xf32, #tpu.memory_space<vmem>>, %arg12: memref<1x32x128xbf16, #tpu.memory_space<vmem>>, %arg13: memref<1x1x128xf32, #tpu.memory_space<vmem>>, %arg14: memref<1x128x32xbf16, #tpu.memory_space<vmem>>, %arg15: memref<1x1x32xf32, #tpu.memory_space<vmem>>, %arg16: memref<16x32xbf16, #tpu.memory_space<vmem>>, %arg17: memref<16x32xf32, #tpu.memory_space<vmem>>, %arg18: memref<1x!tpu.dma_semaphore, #tpu.memory_space<semaphore_mem>>) attributes {dimension_semantics = [#tpu.dimension_semantics<parallel>, #tpu.dimension_semantics<arbitrary>], iteration_bounds = array<i64: 1, 2>, scalar_prefetch = 0 : i64, scratch_operands = 2 : i64, tpu.core_type = #tpu.core_type<tc>, window_params = [{}, {pipeline_mode = #tpu.pipeline_mode<synchronous>, transform_indices = @transform_1, window_bounds = array<i64: 1, 32>}, {pipeline_mode = #tpu.pipeline_mode<synchronous>, transform_indices = @transform_2, window_bounds = array<i64: 1, 32>}, {transform_indices = @transform_3, window_bounds = array<i64: 1, 1, 32>}, {transform_indices = @transform_4, window_bounds = array<i64: 1, 1, 32>}, {transform_indices = @transform_5, window_bounds = array<i64: 1, 32, 96>}, {transform_indices = @transform_6, window_bounds = array<i64: 1, 32, 32>}, {transform_indices = @transform_7, window_bounds = array<i64: 1, 1, 32>}, {transform_indices = @transform_8, window_bounds = array<i64: 1, 1, 32>}, {transform_indices = @transform_9, window_bounds = array<i64: 1, 1, 32>}, {transform_indices = @transform_10, window_bounds = array<i64: 1, 32, 128>}, {transform_indices = @transform_11, window_bounds = array<i64: 1, 1, 128>}, {transform_indices = @transform_12, window_bounds = array<i64: 1, 128, 32>}, {transform_indices = @transform_13, window_bounds = array<i64: 1, 1, 32>}, {transform_indices = @transform_14, window_bounds = array<i64: 16, 32>}]} {
    %c0_i32 = arith.constant 0 : i32
    %0 = arith.cmpi eq, %arg1, %c0_i32 : i32
    %1 = arith.extui %0 : i1 to i32
    %c0_i32_0 = arith.constant 0 : i32
    %2 = arith.cmpi ne, %1, %c0_i32_0 : i32
    scf.if %2 {
      %c16_i32 = arith.constant 16 : i32
      %211 = arith.muli %arg0, %c16_i32 : i32
      %212 = tpu.assume_multiple %211, 8 : i32
      %c0_i32_74 = arith.constant 0 : i32
      %c0_i32_75 = arith.constant 0 : i32
      %213 = tpu.memref_slice %arg2[%212, %c0_i32_75] : memref<16x32xf32, #tpu.memory_space<any>> -> memref<16x32xf32, #tpu.memory_space<any>>
      %214 = tpu.memref_slice %arg18[%c0_i32_74] : memref<1x!tpu.dma_semaphore, #tpu.memory_space<semaphore_mem>> -> memref<1x!tpu.dma_semaphore, #tpu.memory_space<semaphore_mem>>
      %215 = tpu.memref_squeeze %214 : memref<1x!tpu.dma_semaphore, #tpu.memory_space<semaphore_mem>> -> memref<!tpu.dma_semaphore, #tpu.memory_space<semaphore_mem>>
      tpu.enqueue_dma source(%213 : memref<16x32xf32, #tpu.memory_space<any>>) target(%arg17 : memref<16x32xf32, #tpu.memory_space<vmem>>) target_semaphore(%215 : memref<!tpu.dma_semaphore, #tpu.memory_space<semaphore_mem>>)
      %c0_i32_76 = arith.constant 0 : i32
      %c0_i32_77 = arith.constant 0 : i32
      %216 = tpu.memref_slice %arg2[%212, %c0_i32_77] : memref<16x32xf32, #tpu.memory_space<any>> -> memref<16x32xf32, #tpu.memory_space<any>>
      %217 = tpu.memref_slice %arg18[%c0_i32_76] : memref<1x!tpu.dma_semaphore, #tpu.memory_space<semaphore_mem>> -> memref<1x!tpu.dma_semaphore, #tpu.memory_space<semaphore_mem>>
      %218 = tpu.memref_squeeze %217 : memref<1x!tpu.dma_semaphore, #tpu.memory_space<semaphore_mem>> -> memref<!tpu.dma_semaphore, #tpu.memory_space<semaphore_mem>>
      tpu.wait_dma2 semaphore(%218 : memref<!tpu.dma_semaphore, #tpu.memory_space<semaphore_mem>>) src(%216 : memref<16x32xf32, #tpu.memory_space<any>>) dst(%arg17 : memref<16x32xf32, #tpu.memory_space<vmem>>)
    } else {
    }
    %c0 = arith.constant 0 : index
    %c0_1 = arith.constant 0 : index
    %3 = vector.load %arg17[%c0, %c0_1] : memref<16x32xf32, #tpu.memory_space<vmem>>, vector<16x32xf32>
    %4 = tpu.iota {dimensions = array<i32: 0>} : vector<8x8xi32>
    %5 = tpu.iota {dimensions = array<i32: 1>} : vector<8x8xi32>
    %6 = arith.cmpi sle, %5, %4 : vector<8x8xi32>
    %cst = arith.constant 0.000000e+00 : f32
    %cst_2 = arith.constant -1.000000e+30 : f32
    %7 = vector.broadcast %cst : f32 to vector<8x8xf32>
    %8 = vector.broadcast %cst_2 : f32 to vector<8x8xf32>
    %9 = arith.select %6, %7, %8 : vector<8x8xi1>, vector<8x8xf32>
    %c0_3 = arith.constant 0 : index
    %c0_4 = arith.constant 0 : index
    %c0_5 = arith.constant 0 : index
    %10 = vector.load %arg5[%c0_3, %c0_4, %c0_5] : memref<1x1x32xf32, #tpu.memory_space<vmem>>, vector<1x1x32xf32>
    %11 = vector.shape_cast %10 : vector<1x1x32xf32> to vector<1x32xf32>
    %c0_6 = arith.constant 0 : index
    %c0_7 = arith.constant 0 : index
    %c0_8 = arith.constant 0 : index
    %12 = vector.load %arg6[%c0_6, %c0_7, %c0_8] : memref<1x1x32xf32, #tpu.memory_space<vmem>>, vector<1x1x32xf32>
    %13 = vector.shape_cast %12 : vector<1x1x32xf32> to vector<1x32xf32>
    %cst_9 = arith.constant dense<0.000000e+00> : vector<16xf32>
    %14 = vector.multi_reduction <add>, %3, %cst_9 [1] : vector<16x32xf32> to vector<16xf32>
    %15 = vector.shape_cast %14 : vector<16xf32> to vector<16x1xf32>
    %cst_10 = arith.constant 3.200000e+01 : f32
    %16 = vector.broadcast %cst_10 : f32 to vector<16x1xf32>
    %17 = arith.divf %15, %16 : vector<16x1xf32>
    %18 = vector.broadcast %17 : vector<16x1xf32> to vector<16x32xf32>
    %19 = arith.subf %3, %18 : vector<16x32xf32>
    %20 = arith.mulf %19, %19 : vector<16x32xf32>
    %cst_11 = arith.constant dense<0.000000e+00> : vector<16xf32>
    %21 = vector.multi_reduction <add>, %20, %cst_11 [1] : vector<16x32xf32> to vector<16xf32>
    %22 = vector.shape_cast %21 : vector<16xf32> to vector<16x1xf32>
    %cst_12 = arith.constant 3.200000e+01 : f32
    %23 = vector.broadcast %cst_12 : f32 to vector<16x1xf32>
    %24 = arith.divf %22, %23 : vector<16x1xf32>
    %25 = vector.broadcast %17 : vector<16x1xf32> to vector<16x32xf32>
    %26 = arith.subf %3, %25 : vector<16x32xf32>
    %cst_13 = arith.constant 9.99999974E-6 : f32
    %27 = vector.broadcast %cst_13 : f32 to vector<16x1xf32>
    %28 = arith.addf %24, %27 : vector<16x1xf32>
    %29 = math.rsqrt %28 : vector<16x1xf32>
    %30 = vector.broadcast %29 : vector<16x1xf32> to vector<16x32xf32>
    %31 = arith.mulf %26, %30 : vector<16x32xf32>
    %32 = vector.broadcast %11 : vector<1x32xf32> to vector<16x32xf32>
    %33 = arith.mulf %31, %32 : vector<16x32xf32>
    %34 = vector.broadcast %13 : vector<1x32xf32> to vector<16x32xf32>
    %35 = arith.addf %33, %34 : vector<16x32xf32>
    %36 = arith.truncf %35 : vector<16x32xf32> to vector<16x32xbf16>
    %c0_14 = arith.constant 0 : index
    %c0_15 = arith.constant 0 : index
    %c0_16 = arith.constant 0 : index
    %37 = vector.load %arg7[%c0_14, %c0_15, %c0_16] : memref<1x32x96xbf16, #tpu.memory_space<vmem>>, vector<1x32x96xbf16>
    %38 = vector.shape_cast %37 : vector<1x32x96xbf16> to vector<32x96xbf16>
    %cst_17 = arith.constant dense<0.000000e+00> : vector<16x96xf32>
    %39 = tpu.matmul %36, %38, %cst_17 {dimension_numbers = #tpu.dot_dimension_numbers<[1], [0], [0], [1], [0, 0, 1, 1], [], []>} : vector<16x32xbf16>, vector<32x96xbf16>, vector<16x96xf32> -> vector<16x96xf32>
    %40 = vector.extract_strided_slice %39 {offsets = [0, 0], sizes = [16, 8], strides = [1, 1]} : vector<16x96xf32> to vector<16x8xf32>
    %41 = vector.shape_cast %40 : vector<16x8xf32> to vector<2x8x8xf32>
    %42 = arith.truncf %41 : vector<2x8x8xf32> to vector<2x8x8xbf16>
    %43 = vector.extract_strided_slice %39 {offsets = [0, 32], sizes = [16, 8], strides = [1, 1]} : vector<16x96xf32> to vector<16x8xf32>
    %44 = vector.shape_cast %43 : vector<16x8xf32> to vector<2x8x8xf32>
    %45 = arith.truncf %44 : vector<2x8x8xf32> to vector<2x8x8xbf16>
    %46 = vector.extract_strided_slice %39 {offsets = [0, 64], sizes = [16, 8], strides = [1, 1]} : vector<16x96xf32> to vector<16x8xf32>
    %47 = vector.shape_cast %46 : vector<16x8xf32> to vector<2x8x8xf32>
    %48 = arith.truncf %47 : vector<2x8x8xf32> to vector<2x8x8xbf16>
    "tpu.trace_start"() <{level = 10 : i32, message = "btd,bsd->bts"}> : () -> ()
    %cst_18 = arith.constant dense<0.000000e+00> : vector<2x8x8xf32>
    %49 = tpu.matmul %42, %45, %cst_18 {dimension_numbers = #tpu.dot_dimension_numbers<[2], [2], [1], [1], [0, 0, 0, 1, 1, 1], [0], [0]>} : vector<2x8x8xbf16>, vector<2x8x8xbf16>, vector<2x8x8xf32> -> vector<2x8x8xf32>
    "tpu.trace_stop"() : () -> ()
    %cst_19 = arith.constant 0.176776692 : f32
    %50 = vector.broadcast %cst_19 : f32 to vector<2x8x8xf32>
    %51 = arith.mulf %49, %50 : vector<2x8x8xf32>
    %52 = vector.shape_cast %9 : vector<8x8xf32> to vector<1x8x8xf32>
    %53 = vector.broadcast %52 : vector<1x8x8xf32> to vector<2x8x8xf32>
    %54 = arith.addf %51, %53 : vector<2x8x8xf32>
    %cst_20 = arith.constant dense<0xFF800000> : vector<2x8xf32>
    %55 = vector.multi_reduction <maximumf>, %54, %cst_20 [2] : vector<2x8x8xf32> to vector<2x8xf32>
    %56 = vector.shape_cast %55 : vector<2x8xf32> to vector<2x8x1xf32>
    %57 = vector.broadcast %56 : vector<2x8x1xf32> to vector<2x8x8xf32>
    %58 = arith.subf %54, %57 : vector<2x8x8xf32>
    %59 = math.exp %58 : vector<2x8x8xf32>
    %cst_21 = arith.constant dense<0.000000e+00> : vector<2x8xf32>
    %60 = vector.multi_reduction <add>, %59, %cst_21 [2] : vector<2x8x8xf32> to vector<2x8xf32>
    %61 = vector.shape_cast %60 : vector<2x8xf32> to vector<2x8x1xf32>
    %62 = tpu.reciprocal %61 {approx = true} : vector<2x8x1xf32> -> vector<2x8x1xf32>
    %63 = vector.broadcast %62 : vector<2x8x1xf32> to vector<2x8x8xf32>
    %64 = arith.mulf %59, %63 : vector<2x8x8xf32>
    %65 = arith.truncf %64 : vector<2x8x8xf32> to vector<2x8x8xbf16>
    "tpu.trace_start"() <{level = 10 : i32, message = "bts,bsd->btd"}> : () -> ()
    %cst_22 = arith.constant dense<0.000000e+00> : vector<2x8x8xf32>
    %66 = tpu.matmul %65, %48, %cst_22 {dimension_numbers = #tpu.dot_dimension_numbers<[2], [1], [1], [2], [0, 0, 0, 1, 1, 2], [0], [0]>} : vector<2x8x8xbf16>, vector<2x8x8xbf16>, vector<2x8x8xf32> -> vector<2x8x8xf32>
    "tpu.trace_stop"() : () -> ()
    %67 = vector.shape_cast %66 : vector<2x8x8xf32> to vector<16x8xf32>
    %68 = vector.extract_strided_slice %39 {offsets = [0, 8], sizes = [16, 8], strides = [1, 1]} : vector<16x96xf32> to vector<16x8xf32>
    %69 = vector.shape_cast %68 : vector<16x8xf32> to vector<2x8x8xf32>
    %70 = arith.truncf %69 : vector<2x8x8xf32> to vector<2x8x8xbf16>
    %71 = vector.extract_strided_slice %39 {offsets = [0, 40], sizes = [16, 8], strides = [1, 1]} : vector<16x96xf32> to vector<16x8xf32>
    %72 = vector.shape_cast %71 : vector<16x8xf32> to vector<2x8x8xf32>
    %73 = arith.truncf %72 : vector<2x8x8xf32> to vector<2x8x8xbf16>
    %74 = vector.extract_strided_slice %39 {offsets = [0, 72], sizes = [16, 8], strides = [1, 1]} : vector<16x96xf32> to vector<16x8xf32>
    %75 = vector.shape_cast %74 : vector<16x8xf32> to vector<2x8x8xf32>
    %76 = arith.truncf %75 : vector<2x8x8xf32> to vector<2x8x8xbf16>
    "tpu.trace_start"() <{level = 10 : i32, message = "btd,bsd->bts"}> : () -> ()
    %cst_23 = arith.constant dense<0.000000e+00> : vector<2x8x8xf32>
    %77 = tpu.matmul %70, %73, %cst_23 {dimension_numbers = #tpu.dot_dimension_numbers<[2], [2], [1], [1], [0, 0, 0, 1, 1, 1], [0], [0]>} : vector<2x8x8xbf16>, vector<2x8x8xbf16>, vector<2x8x8xf32> -> vector<2x8x8xf32>
    "tpu.trace_stop"() : () -> ()
    %cst_24 = arith.constant 0.176776692 : f32
    %78 = vector.broadcast %cst_24 : f32 to vector<2x8x8xf32>
    %79 = arith.mulf %77, %78 : vector<2x8x8xf32>
    %80 = vector.shape_cast %9 : vector<8x8xf32> to vector<1x8x8xf32>
    %81 = vector.broadcast %80 : vector<1x8x8xf32> to vector<2x8x8xf32>
    %82 = arith.addf %79, %81 : vector<2x8x8xf32>
    %cst_25 = arith.constant dense<0xFF800000> : vector<2x8xf32>
    %83 = vector.multi_reduction <maximumf>, %82, %cst_25 [2] : vector<2x8x8xf32> to vector<2x8xf32>
    %84 = vector.shape_cast %83 : vector<2x8xf32> to vector<2x8x1xf32>
    %85 = vector.broadcast %84 : vector<2x8x1xf32> to vector<2x8x8xf32>
    %86 = arith.subf %82, %85 : vector<2x8x8xf32>
    %87 = math.exp %86 : vector<2x8x8xf32>
    %cst_26 = arith.constant dense<0.000000e+00> : vector<2x8xf32>
    %88 = vector.multi_reduction <add>, %87, %cst_26 [2] : vector<2x8x8xf32> to vector<2x8xf32>
    %89 = vector.shape_cast %88 : vector<2x8xf32> to vector<2x8x1xf32>
    %90 = tpu.reciprocal %89 {approx = true} : vector<2x8x1xf32> -> vector<2x8x1xf32>
    %91 = vector.broadcast %90 : vector<2x8x1xf32> to vector<2x8x8xf32>
    %92 = arith.mulf %87, %91 : vector<2x8x8xf32>
    %93 = arith.truncf %92 : vector<2x8x8xf32> to vector<2x8x8xbf16>
    "tpu.trace_start"() <{level = 10 : i32, message = "bts,bsd->btd"}> : () -> ()
    %cst_27 = arith.constant dense<0.000000e+00> : vector<2x8x8xf32>
    %94 = tpu.matmul %93, %76, %cst_27 {dimension_numbers = #tpu.dot_dimension_numbers<[2], [1], [1], [2], [0, 0, 0, 1, 1, 2], [0], [0]>} : vector<2x8x8xbf16>, vector<2x8x8xbf16>, vector<2x8x8xf32> -> vector<2x8x8xf32>
    "tpu.trace_stop"() : () -> ()
    %95 = vector.shape_cast %94 : vector<2x8x8xf32> to vector<16x8xf32>
    %96 = vector.extract_strided_slice %39 {offsets = [0, 16], sizes = [16, 8], strides = [1, 1]} : vector<16x96xf32> to vector<16x8xf32>
    %97 = vector.shape_cast %96 : vector<16x8xf32> to vector<2x8x8xf32>
    %98 = arith.truncf %97 : vector<2x8x8xf32> to vector<2x8x8xbf16>
    %99 = vector.extract_strided_slice %39 {offsets = [0, 48], sizes = [16, 8], strides = [1, 1]} : vector<16x96xf32> to vector<16x8xf32>
    %100 = vector.shape_cast %99 : vector<16x8xf32> to vector<2x8x8xf32>
    %101 = arith.truncf %100 : vector<2x8x8xf32> to vector<2x8x8xbf16>
    %102 = vector.extract_strided_slice %39 {offsets = [0, 80], sizes = [16, 8], strides = [1, 1]} : vector<16x96xf32> to vector<16x8xf32>
    %103 = vector.shape_cast %102 : vector<16x8xf32> to vector<2x8x8xf32>
    %104 = arith.truncf %103 : vector<2x8x8xf32> to vector<2x8x8xbf16>
    "tpu.trace_start"() <{level = 10 : i32, message = "btd,bsd->bts"}> : () -> ()
    %cst_28 = arith.constant dense<0.000000e+00> : vector<2x8x8xf32>
    %105 = tpu.matmul %98, %101, %cst_28 {dimension_numbers = #tpu.dot_dimension_numbers<[2], [2], [1], [1], [0, 0, 0, 1, 1, 1], [0], [0]>} : vector<2x8x8xbf16>, vector<2x8x8xbf16>, vector<2x8x8xf32> -> vector<2x8x8xf32>
    "tpu.trace_stop"() : () -> ()
    %cst_29 = arith.constant 0.176776692 : f32
    %106 = vector.broadcast %cst_29 : f32 to vector<2x8x8xf32>
    %107 = arith.mulf %105, %106 : vector<2x8x8xf32>
    %108 = vector.shape_cast %9 : vector<8x8xf32> to vector<1x8x8xf32>
    %109 = vector.broadcast %108 : vector<1x8x8xf32> to vector<2x8x8xf32>
    %110 = arith.addf %107, %109 : vector<2x8x8xf32>
    %cst_30 = arith.constant dense<0xFF800000> : vector<2x8xf32>
    %111 = vector.multi_reduction <maximumf>, %110, %cst_30 [2] : vector<2x8x8xf32> to vector<2x8xf32>
    %112 = vector.shape_cast %111 : vector<2x8xf32> to vector<2x8x1xf32>
    %113 = vector.broadcast %112 : vector<2x8x1xf32> to vector<2x8x8xf32>
    %114 = arith.subf %110, %113 : vector<2x8x8xf32>
    %115 = math.exp %114 : vector<2x8x8xf32>
    %cst_31 = arith.constant dense<0.000000e+00> : vector<2x8xf32>
    %116 = vector.multi_reduction <add>, %115, %cst_31 [2] : vector<2x8x8xf32> to vector<2x8xf32>
    %117 = vector.shape_cast %116 : vector<2x8xf32> to vector<2x8x1xf32>
    %118 = tpu.reciprocal %117 {approx = true} : vector<2x8x1xf32> -> vector<2x8x1xf32>
    %119 = vector.broadcast %118 : vector<2x8x1xf32> to vector<2x8x8xf32>
    %120 = arith.mulf %115, %119 : vector<2x8x8xf32>
    %121 = arith.truncf %120 : vector<2x8x8xf32> to vector<2x8x8xbf16>
    "tpu.trace_start"() <{level = 10 : i32, message = "bts,bsd->btd"}> : () -> ()
    %cst_32 = arith.constant dense<0.000000e+00> : vector<2x8x8xf32>
    %122 = tpu.matmul %121, %104, %cst_32 {dimension_numbers = #tpu.dot_dimension_numbers<[2], [1], [1], [2], [0, 0, 0, 1, 1, 2], [0], [0]>} : vector<2x8x8xbf16>, vector<2x8x8xbf16>, vector<2x8x8xf32> -> vector<2x8x8xf32>
    "tpu.trace_stop"() : () -> ()
    %123 = vector.shape_cast %122 : vector<2x8x8xf32> to vector<16x8xf32>
    %124 = vector.extract_strided_slice %39 {offsets = [0, 24], sizes = [16, 8], strides = [1, 1]} : vector<16x96xf32> to vector<16x8xf32>
    %125 = vector.shape_cast %124 : vector<16x8xf32> to vector<2x8x8xf32>
    %126 = arith.truncf %125 : vector<2x8x8xf32> to vector<2x8x8xbf16>
    %127 = vector.extract_strided_slice %39 {offsets = [0, 56], sizes = [16, 8], strides = [1, 1]} : vector<16x96xf32> to vector<16x8xf32>
    %128 = vector.shape_cast %127 : vector<16x8xf32> to vector<2x8x8xf32>
    %129 = arith.truncf %128 : vector<2x8x8xf32> to vector<2x8x8xbf16>
    %130 = vector.extract_strided_slice %39 {offsets = [0, 88], sizes = [16, 8], strides = [1, 1]} : vector<16x96xf32> to vector<16x8xf32>
    %131 = vector.shape_cast %130 : vector<16x8xf32> to vector<2x8x8xf32>
    %132 = arith.truncf %131 : vector<2x8x8xf32> to vector<2x8x8xbf16>
    "tpu.trace_start"() <{level = 10 : i32, message = "btd,bsd->bts"}> : () -> ()
    %cst_33 = arith.constant dense<0.000000e+00> : vector<2x8x8xf32>
    %133 = tpu.matmul %126, %129, %cst_33 {dimension_numbers = #tpu.dot_dimension_numbers<[2], [2], [1], [1], [0, 0, 0, 1, 1, 1], [0], [0]>} : vector<2x8x8xbf16>, vector<2x8x8xbf16>, vector<2x8x8xf32> -> vector<2x8x8xf32>
    "tpu.trace_stop"() : () -> ()
    %cst_34 = arith.constant 0.176776692 : f32
    %134 = vector.broadcast %cst_34 : f32 to vector<2x8x8xf32>
    %135 = arith.mulf %133, %134 : vector<2x8x8xf32>
    %136 = vector.shape_cast %9 : vector<8x8xf32> to vector<1x8x8xf32>
    %137 = vector.broadcast %136 : vector<1x8x8xf32> to vector<2x8x8xf32>
    %138 = arith.addf %135, %137 : vector<2x8x8xf32>
    %cst_35 = arith.constant dense<0xFF800000> : vector<2x8xf32>
    %139 = vector.multi_reduction <maximumf>, %138, %cst_35 [2] : vector<2x8x8xf32> to vector<2x8xf32>
    %140 = vector.shape_cast %139 : vector<2x8xf32> to vector<2x8x1xf32>
    %141 = vector.broadcast %140 : vector<2x8x1xf32> to vector<2x8x8xf32>
    %142 = arith.subf %138, %141 : vector<2x8x8xf32>
    %143 = math.exp %142 : vector<2x8x8xf32>
    %cst_36 = arith.constant dense<0.000000e+00> : vector<2x8xf32>
    %144 = vector.multi_reduction <add>, %143, %cst_36 [2] : vector<2x8x8xf32> to vector<2x8xf32>
    %145 = vector.shape_cast %144 : vector<2x8xf32> to vector<2x8x1xf32>
    %146 = tpu.reciprocal %145 {approx = true} : vector<2x8x1xf32> -> vector<2x8x1xf32>
    %147 = vector.broadcast %146 : vector<2x8x1xf32> to vector<2x8x8xf32>
    %148 = arith.mulf %143, %147 : vector<2x8x8xf32>
    %149 = arith.truncf %148 : vector<2x8x8xf32> to vector<2x8x8xbf16>
    "tpu.trace_start"() <{level = 10 : i32, message = "bts,bsd->btd"}> : () -> ()
    %cst_37 = arith.constant dense<0.000000e+00> : vector<2x8x8xf32>
    %150 = tpu.matmul %149, %132, %cst_37 {dimension_numbers = #tpu.dot_dimension_numbers<[2], [1], [1], [2], [0, 0, 0, 1, 1, 2], [0], [0]>} : vector<2x8x8xbf16>, vector<2x8x8xbf16>, vector<2x8x8xf32> -> vector<2x8x8xf32>
    "tpu.trace_stop"() : () -> ()
    %151 = vector.shape_cast %150 : vector<2x8x8xf32> to vector<16x8xf32>
    %152 = tpu.concatenate %67, %95, %123, %151 in 1 : vector<16x8xf32>, vector<16x8xf32>, vector<16x8xf32>, vector<16x8xf32> -> vector<16x32xf32>
    %153 = arith.truncf %152 : vector<16x32xf32> to vector<16x32xbf16>
    %c0_38 = arith.constant 0 : index
    %c0_39 = arith.constant 0 : index
    %c0_40 = arith.constant 0 : index
    %154 = vector.load %arg8[%c0_38, %c0_39, %c0_40] : memref<1x32x32xbf16, #tpu.memory_space<vmem>>, vector<1x32x32xbf16>
    %155 = vector.shape_cast %154 : vector<1x32x32xbf16> to vector<32x32xbf16>
    %cst_41 = arith.constant dense<0.000000e+00> : vector<16x32xf32>
    %156 = tpu.matmul %153, %155, %cst_41 {dimension_numbers = #tpu.dot_dimension_numbers<[1], [0], [0], [1], [0, 0, 1, 1], [], []>} : vector<16x32xbf16>, vector<32x32xbf16>, vector<16x32xf32> -> vector<16x32xf32>
    %c0_42 = arith.constant 0 : index
    %c0_43 = arith.constant 0 : index
    %c0_44 = arith.constant 0 : index
    %157 = vector.load %arg9[%c0_42, %c0_43, %c0_44] : memref<1x1x32xf32, #tpu.memory_space<vmem>>, vector<1x1x32xf32>
    %158 = vector.shape_cast %157 : vector<1x1x32xf32> to vector<1x32xf32>
    %159 = vector.broadcast %158 : vector<1x32xf32> to vector<16x32xf32>
    %160 = arith.addf %156, %159 : vector<16x32xf32>
    %161 = arith.addf %3, %160 : vector<16x32xf32>
    %c0_45 = arith.constant 0 : index
    %c0_46 = arith.constant 0 : index
    %c0_47 = arith.constant 0 : index
    %162 = vector.load %arg10[%c0_45, %c0_46, %c0_47] : memref<1x1x32xf32, #tpu.memory_space<vmem>>, vector<1x1x32xf32>
    %163 = vector.shape_cast %162 : vector<1x1x32xf32> to vector<1x32xf32>
    %c0_48 = arith.constant 0 : index
    %c0_49 = arith.constant 0 : index
    %c0_50 = arith.constant 0 : index
    %164 = vector.load %arg11[%c0_48, %c0_49, %c0_50] : memref<1x1x32xf32, #tpu.memory_space<vmem>>, vector<1x1x32xf32>
    %165 = vector.shape_cast %164 : vector<1x1x32xf32> to vector<1x32xf32>
    %cst_51 = arith.constant dense<0.000000e+00> : vector<16xf32>
    %166 = vector.multi_reduction <add>, %161, %cst_51 [1] : vector<16x32xf32> to vector<16xf32>
    %167 = vector.shape_cast %166 : vector<16xf32> to vector<16x1xf32>
    %cst_52 = arith.constant 3.200000e+01 : f32
    %168 = vector.broadcast %cst_52 : f32 to vector<16x1xf32>
    %169 = arith.divf %167, %168 : vector<16x1xf32>
    %170 = vector.broadcast %169 : vector<16x1xf32> to vector<16x32xf32>
    %171 = arith.subf %161, %170 : vector<16x32xf32>
    %172 = arith.mulf %171, %171 : vector<16x32xf32>
    %cst_53 = arith.constant dense<0.000000e+00> : vector<16xf32>
    %173 = vector.multi_reduction <add>, %172, %cst_53 [1] : vector<16x32xf32> to vector<16xf32>
    %174 = vector.shape_cast %173 : vector<16xf32> to vector<16x1xf32>
    %cst_54 = arith.constant 3.200000e+01 : f32
    %175 = vector.broadcast %cst_54 : f32 to vector<16x1xf32>
    %176 = arith.divf %174, %175 : vector<16x1xf32>
    %177 = vector.broadcast %169 : vector<16x1xf32> to vector<16x32xf32>
    %178 = arith.subf %161, %177 : vector<16x32xf32>
    %cst_55 = arith.constant 9.99999974E-6 : f32
    %179 = vector.broadcast %cst_55 : f32 to vector<16x1xf32>
    %180 = arith.addf %176, %179 : vector<16x1xf32>
    %181 = math.rsqrt %180 : vector<16x1xf32>
    %182 = vector.broadcast %181 : vector<16x1xf32> to vector<16x32xf32>
    %183 = arith.mulf %178, %182 : vector<16x32xf32>
    %184 = vector.broadcast %163 : vector<1x32xf32> to vector<16x32xf32>
    %185 = arith.mulf %183, %184 : vector<16x32xf32>
    %186 = vector.broadcast %165 : vector<1x32xf32> to vector<16x32xf32>
    %187 = arith.addf %185, %186 : vector<16x32xf32>
    %188 = arith.truncf %187 : vector<16x32xf32> to vector<16x32xbf16>
    %c0_56 = arith.constant 0 : index
    %c0_57 = arith.constant 0 : index
    %c0_58 = arith.constant 0 : index
    %189 = vector.load %arg12[%c0_56, %c0_57, %c0_58] : memref<1x32x128xbf16, #tpu.memory_space<vmem>>, vector<1x32x128xbf16>
    %190 = vector.shape_cast %189 : vector<1x32x128xbf16> to vector<32x128xbf16>
    %cst_59 = arith.constant dense<0.000000e+00> : vector<16x128xf32>
    %191 = tpu.matmul %188, %190, %cst_59 {dimension_numbers = #tpu.dot_dimension_numbers<[1], [0], [0], [1], [0, 0, 1, 1], [], []>} : vector<16x32xbf16>, vector<32x128xbf16>, vector<16x128xf32> -> vector<16x128xf32>
    %c0_60 = arith.constant 0 : index
    %c0_61 = arith.constant 0 : index
    %c0_62 = arith.constant 0 : index
    %192 = vector.load %arg13[%c0_60, %c0_61, %c0_62] : memref<1x1x128xf32, #tpu.memory_space<vmem>>, vector<1x1x128xf32>
    %193 = vector.shape_cast %192 : vector<1x1x128xf32> to vector<1x128xf32>
    %194 = vector.broadcast %193 : vector<1x128xf32> to vector<16x128xf32>
    %195 = arith.addf %191, %194 : vector<16x128xf32>
    %cst_63 = arith.constant 0.000000e+00 : f32
    %196 = vector.broadcast %cst_63 : f32 to vector<16x128xf32>
    %197 = arith.maximumf %195, %196 : vector<16x128xf32>
    %198 = arith.truncf %197 : vector<16x128xf32> to vector<16x128xbf16>
    %c0_64 = arith.constant 0 : index
    %c0_65 = arith.constant 0 : index
    %c0_66 = arith.constant 0 : index
    %199 = vector.load %arg14[%c0_64, %c0_65, %c0_66] : memref<1x128x32xbf16, #tpu.memory_space<vmem>>, vector<1x128x32xbf16>
    %200 = vector.shape_cast %199 : vector<1x128x32xbf16> to vector<128x32xbf16>
    %cst_67 = arith.constant dense<0.000000e+00> : vector<16x32xf32>
    %201 = tpu.matmul %198, %200, %cst_67 {dimension_numbers = #tpu.dot_dimension_numbers<[1], [0], [0], [1], [0, 0, 1, 1], [], []>} : vector<16x128xbf16>, vector<128x32xbf16>, vector<16x32xf32> -> vector<16x32xf32>
    %c0_68 = arith.constant 0 : index
    %c0_69 = arith.constant 0 : index
    %c0_70 = arith.constant 0 : index
    %202 = vector.load %arg15[%c0_68, %c0_69, %c0_70] : memref<1x1x32xf32, #tpu.memory_space<vmem>>, vector<1x1x32xf32>
    %203 = vector.shape_cast %202 : vector<1x1x32xf32> to vector<1x32xf32>
    %204 = vector.broadcast %203 : vector<1x32xf32> to vector<16x32xf32>
    %205 = arith.addf %201, %204 : vector<16x32xf32>
    %206 = arith.addf %161, %205 : vector<16x32xf32>
    %c0_71 = arith.constant 0 : index
    %c0_72 = arith.constant 0 : index
    %207 = vector.load %arg17[%c0_71, %c0_72] : memref<16x32xf32, #tpu.memory_space<vmem>>, vector<16x32xf32>
    tpu.vector_store %arg17[%c0_71, %c0_72], %206 {strides = array<i32>} : memref<16x32xf32, #tpu.memory_space<vmem>>, vector<16x32xf32>,
    %c1_i32 = arith.constant 1 : i32
    %208 = arith.cmpi eq, %arg1, %c1_i32 : i32
    %209 = arith.extui %208 : i1 to i32
    %c0_i32_73 = arith.constant 0 : i32
    %210 = arith.cmpi ne, %209, %c0_i32_73 : i32
    scf.if %210 {
      %c0_74 = arith.constant 0 : index
      %c0_75 = arith.constant 0 : index
      %211 = vector.load %arg3[%c0_74, %c0_75] : memref<1x32xf32, #tpu.memory_space<vmem>>, vector<1x32xf32>
      %c0_76 = arith.constant 0 : index
      %c0_77 = arith.constant 0 : index
      %212 = vector.load %arg4[%c0_76, %c0_77] : memref<1x32xf32, #tpu.memory_space<vmem>>, vector<1x32xf32>
      %cst_78 = arith.constant dense<0.000000e+00> : vector<16xf32>
      %213 = vector.multi_reduction <add>, %206, %cst_78 [1] : vector<16x32xf32> to vector<16xf32>
      %214 = vector.shape_cast %213 : vector<16xf32> to vector<16x1xf32>
      %cst_79 = arith.constant 3.200000e+01 : f32
      %215 = vector.broadcast %cst_79 : f32 to vector<16x1xf32>
      %216 = arith.divf %214, %215 : vector<16x1xf32>
      %217 = vector.broadcast %216 : vector<16x1xf32> to vector<16x32xf32>
      %218 = arith.subf %206, %217 : vector<16x32xf32>
      %219 = arith.mulf %218, %218 : vector<16x32xf32>
      %cst_80 = arith.constant dense<0.000000e+00> : vector<16xf32>
      %220 = vector.multi_reduction <add>, %219, %cst_80 [1] : vector<16x32xf32> to vector<16xf32>
      %221 = vector.shape_cast %220 : vector<16xf32> to vector<16x1xf32>
      %cst_81 = arith.constant 3.200000e+01 : f32
      %222 = vector.broadcast %cst_81 : f32 to vector<16x1xf32>
      %223 = arith.divf %221, %222 : vector<16x1xf32>
      %224 = vector.broadcast %216 : vector<16x1xf32> to vector<16x32xf32>
      %225 = arith.subf %206, %224 : vector<16x32xf32>
      %cst_82 = arith.constant 9.99999974E-6 : f32
      %226 = vector.broadcast %cst_82 : f32 to vector<16x1xf32>
      %227 = arith.addf %223, %226 : vector<16x1xf32>
      %228 = math.rsqrt %227 : vector<16x1xf32>
      %229 = vector.broadcast %228 : vector<16x1xf32> to vector<16x32xf32>
      %230 = arith.mulf %225, %229 : vector<16x32xf32>
      %231 = vector.broadcast %211 : vector<1x32xf32> to vector<16x32xf32>
      %232 = arith.mulf %230, %231 : vector<16x32xf32>
      %233 = vector.broadcast %212 : vector<1x32xf32> to vector<16x32xf32>
      %234 = arith.addf %232, %233 : vector<16x32xf32>
      %235 = arith.truncf %234 : vector<16x32xf32> to vector<16x32xbf16>
      %c0_83 = arith.constant 0 : index
      %c0_84 = arith.constant 0 : index
      %236 = vector.load %arg16[%c0_83, %c0_84] : memref<16x32xbf16, #tpu.memory_space<vmem>>, vector<16x32xbf16>
      tpu.vector_store %arg16[%c0_83, %c0_84], %235 {strides = array<i32>} : memref<16x32xbf16, #tpu.memory_space<vmem>>, vector<16x32xbf16>,
    } else {
    }
    return
  }
  func.func @transform_1(%arg0: i32, %arg1: i32) -> (i32, i32) {
    %c0_i32 = arith.constant 0 : i32
    %c0_i32_0 = arith.constant 0 : i32
    %c0_i32_1 = arith.constant 0 : i32
    return %c0_i32, %c0_i32_0 : i32, i32
  }
  func.func @transform_2(%arg0: i32, %arg1: i32) -> (i32, i32) {
    %c0_i32 = arith.constant 0 : i32
    %c0_i32_0 = arith.constant 0 : i32
    %c0_i32_1 = arith.constant 0 : i32
    return %c0_i32, %c0_i32_0 : i32, i32
  }
  func.func @transform_3(%arg0: i32, %arg1: i32) -> (i32, i32, i32) {
    %c0_i32 = arith.constant 0 : i32
    %c0_i32_0 = arith.constant 0 : i32
    %c0_i32_1 = arith.constant 0 : i32
    return %arg1, %c0_i32, %c0_i32_0 : i32, i32, i32
  }
  func.func @transform_4(%arg0: i32, %arg1: i32) -> (i32, i32, i32) {
    %c0_i32 = arith.constant 0 : i32
    %c0_i32_0 = arith.constant 0 : i32
    %c0_i32_1 = arith.constant 0 : i32
    return %arg1, %c0_i32, %c0_i32_0 : i32, i32, i32
  }
  func.func @transform_5(%arg0: i32, %arg1: i32) -> (i32, i32, i32) {
    %c0_i32 = arith.constant 0 : i32
    %c0_i32_0 = arith.constant 0 : i32
    %c0_i32_1 = arith.constant 0 : i32
    return %arg1, %c0_i32, %c0_i32_0 : i32, i32, i32
  }
  func.func @transform_6(%arg0: i32, %arg1: i32) -> (i32, i32, i32) {
    %c0_i32 = arith.constant 0 : i32
    %c0_i32_0 = arith.constant 0 : i32
    %c0_i32_1 = arith.constant 0 : i32
    return %arg1, %c0_i32, %c0_i32_0 : i32, i32, i32
  }
  func.func @transform_7(%arg0: i32, %arg1: i32) -> (i32, i32, i32) {
    %c0_i32 = arith.constant 0 : i32
    %c0_i32_0 = arith.constant 0 : i32
    %c0_i32_1 = arith.constant 0 : i32
    return %arg1, %c0_i32, %c0_i32_0 : i32, i32, i32
  }
  func.func @transform_8(%arg0: i32, %arg1: i32) -> (i32, i32, i32) {
    %c0_i32 = arith.constant 0 : i32
    %c0_i32_0 = arith.constant 0 : i32
    %c0_i32_1 = arith.constant 0 : i32
    return %arg1, %c0_i32, %c0_i32_0 : i32, i32, i32
  }
  func.func @transform_9(%arg0: i32, %arg1: i32) -> (i32, i32, i32) {
    %c0_i32 = arith.constant 0 : i32
    %c0_i32_0 = arith.constant 0 : i32
    %c0_i32_1 = arith.constant 0 : i32
    return %arg1, %c0_i32, %c0_i32_0 : i32, i32, i32
  }
  func.func @transform_10(%arg0: i32, %arg1: i32) -> (i32, i32, i32) {
    %c0_i32 = arith.constant 0 : i32
    %c0_i32_0 = arith.constant 0 : i32
    %c0_i32_1 = arith.constant 0 : i32
    return %arg1, %c0_i32, %c0_i32_0 : i32, i32, i32
  }
  func.func @transform_11(%arg0: i32, %arg1: i32) -> (i32, i32, i32) {
    %c0_i32 = arith.constant 0 : i32
    %c0_i32_0 = arith.constant 0 : i32
    %c0_i32_1 = arith.constant 0 : i32
    return %arg1, %c0_i32, %c0_i32_0 : i32, i32, i32
  }
  func.func @transform_12(%arg0: i32, %arg1: i32) -> (i32, i32, i32) {
    %c0_i32 = arith.constant 0 : i32
    %c0_i32_0 = arith.constant 0 : i32
    %c0_i32_1 = arith.constant 0 : i32
    return %arg1, %c0_i32, %c0_i32_0 : i32, i32, i32
  }
  func.func @transform_13(%arg0: i32, %arg1: i32) -> (i32, i32, i32) {
    %c0_i32 = arith.constant 0 : i32
    %c0_i32_0 = arith.constant 0 : i32
    %c0_i32_1 = arith.constant 0 : i32
    return %arg1, %c0_i32, %c0_i32_0 : i32, i32, i32
  }
  func.func @transform_14(%arg0: i32, %arg1: i32) -> (i32, i32) {
    %c0_i32 = arith.constant 0 : i32
    %c0_i32_0 = arith.constant 0 : i32
    return %arg0, %c0_i32 : i32, i32
  }
}

</mosaic_0001>

<bundles_post_ra>
// kernel: julpt_forward.3
= control target key start
LH: loop header
LB: loop body
LE: loop exit
PB: predicated region body
PF: predicated region fallthrough
CT: control target
= control target key end

     0   :  { %v117_v0 = vmov 0.0   ;;  %vm118_vm0 = vmmov 0   ;;  %vm45_vm1 = vcmask 261120   ;;  %s157_s1 = inlined_call_operand.vmem [shape: bf16[32,128], index: 1, kind: input, shape index: {}]   ;;  %s158_s0 = inlined_call_operand.vmem [shape: bf16[16,32], index: 0, kind: input, shape index: {}]   ;;  %s159_s2 = inlined_call_operand.vmem [shape: f32[1,128], index: 2, kind: input, shape index: {}]   ;;  %s160_s3 = inlined_call_operand.vmem [shape: f32[16,128], index: 3, kind: output, shape index: {}]  }
   0x1   :  { %104 = vmatprep.subr.bf16.mxu0 %v117_v0  ;;  %v114_v1 = vld [vmem:[%s157_s1 + $0x8] sm:$0xff]   ;;  %108 = vmatprep.mubr.msk.bf16.mxu0 %vm118_vm0, %v117_v0  ;;  %v115_v2 = vld [vmem:[%s157_s1] sm:$0xff]  }
   0x2   :  { %105 = vmatpush3.bf16.msra.mxu0 %v114_v1  ;;  %v116_v3 = vld [vmem:[%s158_s0] sm:$0xff]  }
   0x3   :  { %106 = vmatprep.subr.bf16.mxu0 %v117_v0  ;;  %v96_v4 = vld [vmem:[%s159_s2] ss:$0 sm:$0xff] }
   0x6   :  { %107 = vmatpush3.bf16.msra.mxu0 %v115_v2 }
   0x9   :  { %109 = vmatmul.mubr.msk.bf16.vlgmr.msra.gmra.mxu0 %vm45_vm1, %v116_v3 }
  0xc9   :  { %v83_v5 = vpop.f32.mrf.mxu0 }
  0xca   :  { %v84_v6 = vadd.f32 %v96_v4, %v83_v5 }
  0xcb   :  { %v110_v7 = vpop.f32.mrf.mxu0 }
  0xcc   :  { %90 = vst [vmem:[%s160_s3] sm:$0xff] %v84_v6 }
  0xcd   :  { %v86_v8 = vpop.f32.mrf.mxu0 }
  0xce   :  { %v87_v9 = vadd.f32 %v96_v4, %v86_v8 }
  0xcf   :  { %v111_v10 = vpop.f32.mrf.mxu0 }
  0xd0   :  { %91 = vst [vmem:[%s160_s3 + $0x8] sm:$0xff] %v87_v9 }

// kernel: julpt_forward.2
= control target key start
LH: loop header
LB: loop body
LE: loop exit
PB: predicated region body
PF: predicated region fallthrough
CT: control target
= control target key end

     0   :  { %s2741_s29 = smov 0   ;;  %s2743_s30 = smov 0   ;;  %s3103_s0 = inlined_call_operand.vmem [shape: f32[16,32], index: 0, kind: input, shape index: {}]   ;;  %s3104_s1 = inlined_call_operand.vmem [shape: f32[1,32], index: 1, kind: input, shape index: {}]   ;;  %s3105_s2 = inlined_call_operand.vmem [shape: f32[1,32], index: 2, kind: input, shape index: {}]   ;;  %s3106_s3 = inlined_call_operand.vmem [shape: f32[2,1,32], index: 3, kind: input, shape index: {}]   ;;  %s3107_s4 = inlined_call_operand.vmem [shape: f32[2,1,32], index: 4, kind: input, shape index: {}]   ;;  %s3108_s5 = inlined_call_operand.vmem [shape: bf16[2,32,96], index: 5, kind: input, shape index: {}]   ;;  %s3109_s6 = inlined_call_operand.vmem [shape: bf16[2,32,32], index: 6, kind: input, shape index: {}]   ;;  %s3110_s7 = inlined_call_operand.vmem [shape: f32[2,1,32], index: 7, kind: input, shape index: {}]   ;;  %s3111_s8 = inlined_call_operand.vmem [shape: f32[2,1,32], index: 8, kind: input, shape index: {}]   ;;  %s3112_s9 = inlined_call_operand.vmem [shape: f32[2,1,32], index: 9, kind: input, shape index: {}]   ;;  %s3113_s10 = inlined_call_operand.vmem [shape: bf16[2,32,128], index: 10, kind: input, shape index: {}]   ;;  %s3114_s11 = inlined_call_operand.vmem [shape: f32[2,1,128], index: 11, kind: input, shape index: {}]   ;;  %s3115_s12 = inlined_call_operand.vmem [shape: bf16[2,128,32], index: 12, kind: input, shape index: {}]   ;;  %s3116_s13 = inlined_call_operand.vmem [shape: f32[2,1,32], index: 13, kind: input, shape index: {}]   ;;  %s3117_s14 = inlined_call_operand.vmem [shape: bf16[16,32], index: 14, kind: output, shape index: {}]  }
   0x1   :  { %3121 = sst [smem:[#allocation9_spill]] %s3104_s1  ;;  %s2745_s15 = smov 0  }
   0x2   :  { %3122 = sst [smem:[#allocation10_spill]] %s3105_s2 }
   0x3   :  { %3123 = sst [smem:[#allocation11_spill]] %s3108_s5 }
   0x4   :  { %3124 = sst [smem:[#allocation12_spill]] %s3109_s6 }
   0x5   :  { %3125 = sst [smem:[#allocation13_spill]] %s3117_s14 }
   0x6 LB: > { %3126 = sst [smem:[#allocation6_spill]] %s2643_s30  ;;  %s33_s16 = sadd.s32 1, %s2643_s30  ;;  %s2647_s15 = sphi %s2745_s15, %s24_s15   ;;  %s2643_s30 = sphi %s2743_s30, %s3140_s30   ;;  %s2639_s29 = sphi %s2741_s29, %s3139_s29  }
   0x7   : > { %3127 = sst [smem:[#allocation7_spill]] %s2647_s15  ;;  %p2253_p0 = scmp.ge.s32.totalorder %s2647_s15, 1 }
   0x8   : > { %p34_p1 = scmp.ge.s32.totalorder %s33_s16, 2  ;;  %p486_p2 = scmp.lt.s32.totalorder %s2647_s15, 3 }
   0xa   : > { %s3142_s16 = smov (%p34_p1, %s33_s16), 0  ;;  %p487_p3 = pnand %p2253_p0, %p486_p2 }
   0xb   : > { %3128 = sst [smem:[#allocation8_spill]] %s3142_s16  ;;  %p566_p4 = scmp.lt.s32.totalorder (!%p487_p3), %s2639_s29, 1 }
   0xc   : > { %490 = sbr.rel (%p487_p3) target bundleno = 4291 (0x10c3), region = 72  ;;  %s3129_s5 = sld [smem:[#allocation11_spill]] (!%p487_p3) }
   0xd   : > { %s3130_s6 = sld [smem:[#allocation12_spill]] (!%p487_p3)  ;;  %p2262_p5 = scmp.ne.s32.totalorder (!%p487_p3), %s2639_s29, 0 }
  0x11   : > { %s2763_s17 = scalar_select %p566_p4, %s2639_s29, 1 }
  0x13   : > { %s2313_s24 = sshll.u32 %s2763_s17, 4  ;;  %s590_s2 = scalar_lea.vmem %s3112_s9, %s2763_s17 }
  0x14   : > { %s2781_s19 = scalar_lea.vmem %s3129_s5, %s2313_s24  ;;  %s2786_s15 = scalar_lea.vmem %s3130_s6, %s2313_s24 }
  0x15   : > { %s2799_s27 = scalar_lea.vmem %s3113_s10, %s2313_s24  ;;  %s598_s5 = scalar_lea.vmem %s3114_s11, %s2763_s17 }
  0x16   : > { %s2316_s30 = sshll.u32 %s2763_s17, 6  ;;  %s606_s1 = scalar_lea.vmem %s3116_s13, %s2763_s17 }
  0x17   : > { %s2813_s21 = scalar_lea.vmem %s3115_s12, %s2316_s30  ;;  %617 = sbr.rel (%p2262_p5) target bundleno = 33 (0x21), region = 76 }
  0x1c   : > { %v653_v0 = vld [vmem:[%s3103_s0] sm:$0xff]  ;;  %v655_v1 = vld [vmem:[%s3103_s0 + $0x8] sm:$0xff] }
  0x1d   : > { %654 = vst [vmem:[#allocation2] sm:$0xff] %v653_v0  ;;  %656 = vst [vmem:[#allocation2 + $0x8] sm:$0xff] %v655_v1 }
  0x1e   : > { %664 = vsyncadd [#allocation3], 256 }
  0x1f   : > { %2635 = dma.done.wait [#allocation3], 256 }
  0x20   : > { %2636 = vsyncadd [#allocation3], 4294967040 }
  0x21 PF: > { %vm678_vm0 = vcmask 261120   ;;  %v2565_v16 = vld [vmem:[%s2781_s19 + $0x8] sm:$0xff]   ;;  %v2649_v17 = vmov 0.0   ;;  %vm2650_vm1 = vmmov 0   ;;  %v2566_v18 = vld [vmem:[%s2781_s19] sm:$0xff]   ;;  %s3131_s26 = scalar_lea.vmem %s3106_s3, %s2763_s17  ;;  %s3132_s30 = scalar_lea.vmem %s3107_s4, %s2763_s17  ;;  %vm788_vm2 = vcmask 64512  }
  0x22   : > { %2369 = vmatprep.subr.bf16.mxu0 %v2649_v17  ;;  %2373 = vmatprep.mubr.msk.bf16.mxu0 %vm2650_vm1, %v2649_v17  ;;  %v2263_v27 = vld [vmem:[%s3131_s26] ss:$0 sm:$0xff]  ;;  %s2651_s16 = smov 96   ;;  %v670_v46 = vlaneseq  ;;  %v2652_v50 = vmov -1e+30   ;;  %s2653_s14 = smov 64  }
  0x23   : > { %2370 = vmatpush3.bf16.msra.mxu0 %v2565_v16  ;;  %2389 = vmatprep.subr.bf16.mxu1 %v2649_v17  ;;  %v2264_v31 = vld [vmem:[%s3132_s30] ss:$0 sm:$0xff]  ;;  %s2654_s20 = smov 88   ;;  %vm917_vm4 = vcmask 1043456   ;;  %s2655_s23 = smov 120   ;;  %vm1707_vm5 = vcmask 130048  }
  0x24   : > { %v2822_v2 = vld [vmem:[#allocation2] sm:$0xff]  ;;  %v2824_v3 = vld [vmem:[#allocation2 + $0x8] sm:$0xff]  ;;  %2371 = vmatprep.subr.bf16.mxu0 %v2649_v17  ;;  %2391 = vmatprep.mubr.msk.bf16.mxu1 %vm2650_vm1, %v2649_v17  ;;  %v671_v47 = vshrl.u32 %v670_v46, 7  ;;  %v673_v48 = vand.u32 127, %v670_v46  ;;  %s2656_s24 = smov 56   ;;  %s2657_s22 = smov 80  }
  0x25   : > { %v679_v4 = vsel %vm678_vm0, %v2822_v2, 0.0  ;;  %v682_v5 = vsel %vm678_vm0, %v2824_v3, 0.0  ;;  %s2658_s25 = smov 112   ;;  %s2659_s6 = smov 48   ;;  %vm1710_vm6 = vcmask 195584  }
  0x26   : > { %680 = vadd.xlane.f32.xlu0 %v679_v4  ;;  %vm674_vm3 = vcmp.le.s32.totalorder %v673_v48, %v671_v47  ;;  %s2660_s19 = smov 72   ;;  %s2661_s26 = smov 104  }
  0x27   : > { %2372 = vmatpush3.bf16.msra.mxu0 %v2566_v18  ;;  %v2875_v51 = vsel %vm674_vm3, 0.0, %v2652_v50  ;;  %s2662_s28 = smov 40   ;;  %s2663_s18 = smov 8  }
  0x28   : > { %2377 = vmatprep.subr.bf16.mxu0 %v2649_v17  ;;  %s2664_s30 = smov 16   ;;  %p2303_p6 = scmp.ne.s32.totalorder %s2639_s29, 1 }
  0x29   : > { %s3135_s29 = sld [smem:[#allocation9_spill]] (!%p2303_p6) }
  0x2a   : > { %683 = vadd.xlane.f32.xlu0 %v682_v5 }
  0xaf   : > { %v681_v6 = vpop.xlane.xlu0 %680 }
  0xb0   : > { %v686_v7 = vmul.f32 0.03125, %v681_v6 }
  0xb2   : > { %v688_v8 = vsub.f32 %v2822_v2, %v686_v7 }
  0xb3   : > { %v684_v9 = vpop.xlane.xlu0 %683 }
  0xb4   : > { %v687_v10 = vmul.f32 0.03125, %v684_v9  ;;  %v690_v11 = vmul.f32 %v688_v8, %v688_v8 }
  0xb6   : > { %v689_v12 = vsub.f32 %v2824_v3, %v687_v10  ;;  %v692_v13 = vsel %vm678_vm0, %v690_v11, 0.0 }
  0xb7   : > { %693 = vadd.xlane.f32.xlu1 %v692_v13 }
  0xb8   : > { %v691_v14 = vmul.f32 %v689_v12, %v689_v12 }
  0xba   : > { %v695_v15 = vsel %vm678_vm0, %v691_v14, 0.0 }
  0xbb   : > { %696 = vadd.xlane.f32.xlu1 %v695_v15 }
 0x140   : > { %v694_v19 = vpop.xlane.xlu1 %693 }
 0x141   : > { %v698_v20 = vmul.f32 0.03125, %v694_v19 }
 0x143   : > { %v700_v21 = vadd.f32 1e-05, %v698_v20 }
 0x144   : > { %v697_v22 = vpop.xlane.xlu1 %696 }
 0x145   : > { %2579 = vrsqrt.f32 %v700_v21  ;;  %v699_v23 = vmul.f32 0.03125, %v697_v22 }
 0x147   : > { %v701_v24 = vadd.f32 1e-05, %v699_v23 }
 0x149   : > { %2581 = vrsqrt.f32 %v701_v24 }
 0x152   : > { %v2580_v25 = vpop.eup %2579 }
 0x153   : > { %v704_v26 = vmul.f32 %v2580_v25, %v688_v8 }
 0x155   : > { %v712_v30 = vmul.f32 %v2263_v27, %v704_v26 }
 0x156   : > { %v2582_v28 = vpop.eup %2581 }
 0x157   : > { %v705_v29 = vmul.f32 %v2582_v28, %v689_v12  ;;  %v720_v33 = vadd.f32 %v2264_v31, %v712_v30 }
 0x159   : > { %v713_v32 = vmul.f32 %v2263_v27, %v705_v29 }
 0x15b   : > { %v721_v34 = vadd.f32 %v2264_v31, %v713_v32 }
 0x15d   : > { %v722_v35 = vpack.c.bf16 %v721_v34, %v720_v33 }
 0x15f   : > { %2374 = vmatmul.mubr.msk.bf16.vlgmr.msra.gmra.mxu0 %vm678_vm0, %v722_v35 }
 0x160   : > { %2379 = vmatprep.mubr.msk.bf16.mxu0 %vm2650_vm1, %v2649_v17 }
 0x21f   : > { %v776_v36 = vpop.f32.mrf.mxu0 }
 0x220   : > { %v2857_v37 = vpack.c.bf16 %v776_v36, %v776_v36 }
 0x221   : > { %v2375_v38 = vpop.f32.mrf.mxu0 }
 0x222   : > { %786 = vrot.lane.b32.xlu0 %v2857_v37, %s2651_s16 }
 0x223   : > { %v779_v39 = vpop.f32.mrf.mxu0 }
 0x224   : > { %v2860_v40 = vpack.c.bf16 %v779_v39, %v779_v39 }
 0x225   : > { %v2376_v41 = vpop.f32.mrf.mxu0 }
 0x226   : > { %836 = vrot.lane.b32.xlu1 %v2860_v40, %s2651_s16  ;;  %s2665_s16 = smov 24  }
 0x294   : > { %v787_v42 = vpop.permute.xlu0 %786 }
 0x295   : > { %v793_v43 = vsel %vm788_vm2, %v787_v42, 0 }
 0x296   : > { %2378 = vmatpush3.bf16.xpose.msra.mxu0 %v793_v43 }
 0x297   : > { %2383 = vmatprep.subr.bf16.mxu0 %v2649_v17 }
 0x298   : > { %v837_v44 = vpop.permute.xlu1 %836 }
 0x299   : > { %v842_v45 = vsel %vm788_vm2, %v837_v44, 0 }
 0x29d   : > { %2380 = vmatmul.mubr.msk.bf16.vlgmr.msra.gmra.mxu0 %vm788_vm2, %v2857_v37 }
 0x29e   : > { %2384 = vmatpush3.bf16.xpose.msra.mxu0 %v842_v45  ;;  %2385 = vmatprep.mubr.msk.bf16.mxu0 %vm2650_vm1, %v2649_v17 }
 0x29f   : > { %2395 = vmatprep.subr.bf16.mxu0 %v2649_v17 }
 0x2a5   : > { %2386 = vmatmul.mubr.msk.bf16.vlgmr.msra.gmra.mxu0 %vm788_vm2, %v2860_v40 }
 0x2a6   : > { %2397 = vmatprep.mubr.msk.bf16.mxu0 %vm2650_vm1, %v2649_v17 }
 0x35d   : > { %v829_v49 = vpop.f32.mrf.mxu0 }
 0x35e   : > { %v884_v52 = vmul.f32 0.17677669, %v829_v49 }
 0x35f   : > { %v2381_v53 = vpop.f32.mrf.mxu0 }
 0x360   : > { %v886_v54 = vadd.f32 %v884_v52, %v2875_v51 }
 0x361   : > { %v832_v55 = vpop.f32.mrf.mxu0 }
 0x362   : > { %v888_v56 = vsel %vm788_vm2, %v886_v54, -inf }
 0x363   : > { %889 = vmax.xlane.f32.xlu1 %v888_v56  ;;  %v2382_v57 = vpop.f32.mrf.mxu0 }
 0x365   : > { %v878_v58 = vpop.f32.mrf.mxu0 }
 0x366   : > { %v885_v59 = vmul.f32 0.17677669, %v878_v58 }
 0x367   : > { %v2387_v60 = vpop.f32.mrf.mxu0 }
 0x368   : > { %v887_v61 = vadd.f32 %v885_v59, %v2875_v51 }
 0x369   : > { %v881_v62 = vpop.f32.mrf.mxu0 }
 0x36a   : > { %v891_v63 = vsel %vm788_vm2, %v887_v61, -inf }
 0x36b   : > { %892 = vmax.xlane.f32.xlu0 %v891_v63  ;;  %v2388_v0 = vpop.f32.mrf.mxu0 }
 0x374   : > { %961 = vrot.lane.b32.xlu1 %v2860_v40, %s2653_s14 }
 0x378   : > { %1011 = vrot.lane.b32.xlu1 %v2857_v37, %s2654_s20 }
 0x3ec   : > { %v890_v1 = vpop.xlane.xlu1 %889 }
 0x3ed   : > { %v894_v4 = vsub.f32 %v886_v54, %v890_v1 }
 0x3ef   : > { %v896_v5 = vmul.f32 1.442695, %v894_v4 }
 0x3f0   : > { %v962_v6 = vpop.permute.xlu1 %961 }
 0x3f1   : > { %2583 = vpow2.f32 %v896_v5  ;;  %v967_v7 = vsel %vm917_vm4, %v962_v6, 0 }
 0x3f2   : > { %2396 = vmatpush3.bf16.msra.mxu0 %v967_v7 }
 0x3f3   : > { %2407 = vmatprep.subr.bf16.mxu0 %v2649_v17 }
 0x3f4   : > { %v893_v8 = vpop.xlane.xlu0 %892  ;;  %v1012_v16 = vpop.permute.xlu1 %1011 }
 0x3f5   : > { %v895_v9 = vsub.f32 %v887_v61, %v893_v8  ;;  %v1017_v24 = vsel %vm788_vm2, %v1012_v16, 0 }
 0x3f7   : > { %v898_v10 = vmul.f32 1.442695, %v895_v9 }
 0x3f9   : > { %2585 = vpow2.f32 %v898_v10 }
 0x3fe   : > { %v2584_v11 = vpop.eup %2583 }
 0x3ff   : > { %v900_v12 = vsel %vm788_vm2, %v2584_v11, 0.0 }
 0x400   : > { %901 = vadd.xlane.f32.xlu0 %v900_v12 }
 0x406   : > { %v2586_v13 = vpop.eup %2585 }
 0x407   : > { %v903_v14 = vsel %vm788_vm2, %v2586_v13, 0.0 }
 0x408   : > { %904 = vadd.xlane.f32.xlu1 %v903_v14 }
 0x416   : > { %912 = vrot.lane.b32.xlu0 %v2857_v37, %s2653_s14 }
 0x419   : > { %1061 = vrot.lane.b32.xlu1 %v2860_v40, %s2654_s20  ;;  %s3133_s20 = scalar_lea.vmem %s3110_s7, %s2763_s17 }
 0x41a   : > { %1009 = vrot.lane.b32.xlu0 %v2857_v37, %s2655_s23 }
 0x41d   : > { %1059 = vrot.lane.b32.xlu1 %v2860_v40, %s2655_s23 }
 0x489   : > { %v902_v15 = vpop.xlane.xlu0 %901 }
 0x48a   : > { %2587 = vrcp.f32 %v902_v15 }
 0x48d   : > { %v913_v18 = vpop.permute.xlu0 %912 }
 0x48e   : > { %v919_v19 = vsel %vm917_vm4, %v913_v18, 0 }
 0x48f   : > { %2390 = vmatpush3.bf16.msra.mxu1 %v919_v19 }
 0x490   : > { %2401 = vmatprep.subr.bf16.mxu1 %v2649_v17 }
 0x491   : > { %v905_v20 = vpop.xlane.xlu1 %904  ;;  %v1010_v29 = vpop.permute.xlu0 %1009 }
 0x492   : > { %2589 = vrcp.f32 %v905_v20 }
 0x495   : > { %v1062_v27 = vpop.permute.xlu1 %1061 }
 0x496   : > { %v1067_v30 = vsel %vm788_vm2, %v1062_v27, 0 }
 0x497   : > { %v2588_v21 = vpop.eup %2587 }
 0x498   : > { %v908_v22 = vmul.f32 %v2588_v21, %v2584_v11 }
 0x499   : > { %v1060_v31 = vpop.permute.xlu1 %1059 }
 0x49a   : > { %v910_v23 = vpack.c.bf16 %v908_v22, %v908_v22 }
 0x49c   : > { %2392 = vmatmul.mubr.msk.bf16.vlgmr.msra.gmra.mxu1 %vm788_vm2, %v910_v23 }
 0x49d   : > { %2402 = vmatpush3.bf16.xpose.msra.mxu1 %v1017_v24  ;;  %2403 = vmatprep.mubr.msk.bf16.mxu1 %vm2650_vm1, %v2649_v17 }
 0x49e   : > { %2413 = vmatprep.subr.bf16.mxu1 %v2649_v17 }
 0x49f   : > { %v2590_v25 = vpop.eup %2589 }
 0x4a0   : > { %v909_v26 = vmul.f32 %v2590_v25, %v2586_v13 }
 0x4a2   : > { %v911_v28 = vpack.c.bf16 %v909_v26, %v909_v26 }
 0x4a4   : > { %2398 = vmatmul.mubr.msk.bf16.vlgmr.msra.gmra.mxu0 %vm788_vm2, %v911_v28  ;;  %2404 = vmatmul.mubr.msk.bf16.vlgmr.msra.gmra.mxu1 %vm788_vm2, %v1010_v29 }
 0x4a5   : > { %2408 = vmatpush3.bf16.xpose.msra.mxu0 %v1067_v30  ;;  %2409 = vmatprep.mubr.msk.bf16.mxu0 %vm2650_vm1, %v2649_v17 }
 0x4a6   : > { %2419 = vmatprep.subr.bf16.mxu0 %v2649_v17  ;;  %2415 = vmatprep.mubr.msk.bf16.mxu1 %vm2650_vm1, %v2649_v17 }
 0x4ac   : > { %2410 = vmatmul.mubr.msk.bf16.vlgmr.msra.gmra.mxu0 %vm788_vm2, %v1060_v31 }
 0x4ad   : > { %2421 = vmatprep.mubr.msk.bf16.mxu0 %vm2650_vm1, %v2649_v17 }
 0x55c   : > { %v2909_v32 = vpop.f32.mrf.mxu1 }
 0x55e   : > { %v2393_v33 = vpop.f32.mrf.mxu1 }
 0x560   : > { %v958_v34 = vpop.f32.mrf.mxu1 }
 0x562   : > { %v2394_v35 = vpop.f32.mrf.mxu1 }
 0x564   : > { %v2911_v36 = vpop.f32.mrf.mxu0  ;;  %v1053_v38 = vpop.f32.mrf.mxu1 }
 0x565   : > { %v1109_v39 = vmul.f32 0.17677669, %v1053_v38 }
 0x566   : > { %v2399_v41 = vpop.f32.mrf.mxu0  ;;  %v2405_v42 = vpop.f32.mrf.mxu1 }
 0x567   : > { %v1111_v43 = vadd.f32 %v1109_v39, %v2875_v51 }
 0x568   : > { %v1006_v44 = vpop.f32.mrf.mxu0  ;;  %v1056_v45 = vpop.f32.mrf.mxu1 }
 0x569   : > { %v1113_v46 = vsel %vm788_vm2, %v1111_v43, -inf }
 0x56a   : > { %1114 = vmax.xlane.f32.xlu0 %v1113_v46  ;;  %v2400_v47 = vpop.f32.mrf.mxu0  ;;  %v2406_v48 = vpop.f32.mrf.mxu1 }
 0x56c   : > { %v1103_v49 = vpop.f32.mrf.mxu0 }
 0x56d   : > { %v1110_v50 = vmul.f32 0.17677669, %v1103_v49 }
 0x56e   : > { %v2411_v52 = vpop.f32.mrf.mxu0 }
 0x56f   : > { %v1112_v53 = vadd.f32 %v1110_v50, %v2875_v51 }
 0x570   : > { %v1106_v54 = vpop.f32.mrf.mxu0 }
 0x571   : > { %v1116_v55 = vsel %vm788_vm2, %v1112_v53, -inf }
 0x572   : > { %1117 = vmax.xlane.f32.xlu1 %v1116_v55  ;;  %v2412_v56 = vpop.f32.mrf.mxu0 }
 0x583   : > { %1185 = vrot.lane.b32.xlu1 %v2860_v40, %s2656_s24 }
 0x587   : > { %1235 = vrot.lane.b32.xlu1 %v2857_v37, %s2657_s22 }
 0x58b   : > { %1285 = vrot.lane.b32.xlu1 %v2860_v40, %s2657_s22 }
 0x58f   : > { %1283 = vrot.lane.b32.xlu1 %v2860_v40, %s2658_s25 }
 0x5f3   : > { %v1115_v57 = vpop.xlane.xlu0 %1114 }
 0x5f4   : > { %v1119_v58 = vsub.f32 %v1111_v43, %v1115_v57 }
 0x5f6   : > { %v1121_v59 = vmul.f32 1.442695, %v1119_v58 }
 0x5f8   : > { %2591 = vpow2.f32 %v1121_v59 }
 0x5fb   : > { %v1118_v60 = vpop.xlane.xlu1 %1117 }
 0x5fc   : > { %v1120_v61 = vsub.f32 %v1112_v53, %v1118_v60 }
 0x5fe   : > { %v1123_v62 = vmul.f32 1.442695, %v1120_v61 }
 0x5ff   : > { %v1186_v63 = vpop.permute.xlu1 %1185 }
 0x600   : > { %2593 = vpow2.f32 %v1123_v62  ;;  %v1191_v0 = vsel %vm917_vm4, %v1186_v63, 0 }
 0x601   : > { %2420 = vmatpush3.bf16.msra.mxu0 %v1191_v0 }
 0x602   : > { %2431 = vmatprep.subr.bf16.mxu0 %v2649_v17 }
 0x603   : > { %v1236_v13 = vpop.permute.xlu1 %1235 }
 0x604   : > { %v1241_v15 = vsel %vm788_vm2, %v1236_v13, 0 }
 0x605   : > { %v2592_v1 = vpop.eup %2591 }
 0x606   : > { %v1125_v4 = vsel %vm788_vm2, %v2592_v1, 0.0 }
 0x607   : > { %1126 = vadd.xlane.f32.xlu0 %v1125_v4  ;;  %v1286_v19 = vpop.permute.xlu1 %1285 }
 0x608   : > { %v1291_v22 = vsel %vm788_vm2, %v1286_v19, 0 }
 0x60b   : > { %v1284_v23 = vpop.permute.xlu1 %1283 }
 0x60d   : > { %v2594_v5 = vpop.eup %2593 }
 0x60e   : > { %v1128_v6 = vsel %vm788_vm2, %v2594_v5, 0.0 }
 0x60f   : > { %1129 = vadd.xlane.f32.xlu0 %v1128_v6 }
 0x625   : > { %1137 = vrot.lane.b32.xlu0 %v2857_v37, %s2656_s24  ;;  %s3134_s24 = scalar_lea.vmem %s3111_s8, %s2763_s17 }
 0x629   : > { %1233 = vrot.lane.b32.xlu0 %v2857_v37, %s2658_s25 }
 0x690   : > { %v1127_v7 = vpop.xlane.xlu0 %1126 }
 0x691   : > { %2595 = vrcp.f32 %v1127_v7 }
 0x698   : > { %v1130_v8 = vpop.xlane.xlu0 %1129 }
 0x699   : > { %2597 = vrcp.f32 %v1130_v8 }
 0x69c   : > { %v1138_v9 = vpop.permute.xlu0 %1137 }
 0x69d   : > { %v1143_v10 = vsel %vm917_vm4, %v1138_v9, 0 }
 0x69e   : > { %v2596_v11 = vpop.eup %2595  ;;  %2414 = vmatpush3.bf16.msra.mxu1 %v1143_v10 }
 0x69f   : > { %2425 = vmatprep.subr.bf16.mxu1 %v2649_v17  ;;  %v1133_v12 = vmul.f32 %v2596_v11, %v2592_v1 }
 0x6a0   : > { %v1234_v21 = vpop.permute.xlu0 %1233 }
 0x6a1   : > { %v1135_v14 = vpack.c.bf16 %v1133_v12, %v1133_v12 }
 0x6a3   : > { %2416 = vmatmul.mubr.msk.bf16.vlgmr.msra.gmra.mxu1 %vm788_vm2, %v1135_v14 }
 0x6a4   : > { %2426 = vmatpush3.bf16.xpose.msra.mxu1 %v1241_v15  ;;  %2427 = vmatprep.mubr.msk.bf16.mxu1 %vm2650_vm1, %v2649_v17 }
 0x6a5   : > { %2437 = vmatprep.subr.bf16.mxu1 %v2649_v17 }
 0x6a6   : > { %v2598_v16 = vpop.eup %2597 }
 0x6a7   : > { %v1134_v18 = vmul.f32 %v2598_v16, %v2594_v5 }
 0x6a9   : > { %v1136_v20 = vpack.c.bf16 %v1134_v18, %v1134_v18 }
 0x6ab   : > { %2422 = vmatmul.mubr.msk.bf16.vlgmr.msra.gmra.mxu0 %vm788_vm2, %v1136_v20  ;;  %2428 = vmatmul.mubr.msk.bf16.vlgmr.msra.gmra.mxu1 %vm788_vm2, %v1234_v21 }
 0x6ac   : > { %2432 = vmatpush3.bf16.xpose.msra.mxu0 %v1291_v22  ;;  %2433 = vmatprep.mubr.msk.bf16.mxu0 %vm2650_vm1, %v2649_v17 }
 0x6ad   : > { %2443 = vmatprep.subr.bf16.mxu0 %v2649_v17  ;;  %2439 = vmatprep.mubr.msk.bf16.mxu1 %vm2650_vm1, %v2649_v17 }
 0x6b3   : > { %2434 = vmatmul.mubr.msk.bf16.vlgmr.msra.gmra.mxu0 %vm788_vm2, %v1284_v23 }
 0x6b4   : > { %2445 = vmatprep.mubr.msk.bf16.mxu0 %vm2650_vm1, %v2649_v17 }
 0x763   : > { %v2945_v24 = vpop.f32.mrf.mxu1 }
 0x765   : > { %v2417_v25 = vpop.f32.mrf.mxu1 }
 0x767   : > { %v1182_v26 = vpop.f32.mrf.mxu1 }
 0x769   : > { %v2418_v27 = vpop.f32.mrf.mxu1 }
 0x76b   : > { %v2947_v28 = vpop.f32.mrf.mxu0  ;;  %v1277_v29 = vpop.f32.mrf.mxu1 }
 0x76c   : > { %v2550_v30 = vpack.i.bf16 %v2947_v28, %v2945_v24  ;;  %v1333_v31 = vmul.f32 0.17677669, %v1277_v29 }
 0x76d   : > { %v2423_v33 = vpop.f32.mrf.mxu0  ;;  %v2429_v34 = vpop.f32.mrf.mxu1 }
 0x76e   : > { %v1335_v35 = vadd.f32 %v1333_v31, %v2875_v51 }
 0x76f   : > { %v1230_v38 = vpop.f32.mrf.mxu0  ;;  %v1280_v39 = vpop.f32.mrf.mxu1 }
 0x770   : > { %v1337_v41 = vsel %vm788_vm2, %v1335_v35, -inf }
 0x771   : > { %1338 = vmax.xlane.f32.xlu0 %v1337_v41  ;;  %v2424_v42 = vpop.f32.mrf.mxu0  ;;  %v2430_v43 = vpop.f32.mrf.mxu1 }
 0x773   : > { %v1327_v44 = vpop.f32.mrf.mxu0 }
 0x774   : > { %v1334_v45 = vmul.f32 0.17677669, %v1327_v44 }
 0x775   : > { %v2435_v46 = vpop.f32.mrf.mxu0 }
 0x776   : > { %v1336_v47 = vadd.f32 %v1334_v45, %v2875_v51 }
 0x777   : > { %v1330_v48 = vpop.f32.mrf.mxu0 }
 0x778   : > { %v1340_v49 = vsel %vm788_vm2, %v1336_v47, -inf }
 0x779   : > { %1341 = vmax.xlane.f32.xlu1 %v1340_v49  ;;  %v2436_v50 = vpop.f32.mrf.mxu0 }
 0x78a   : > { %1409 = vrot.lane.b32.xlu1 %v2860_v40, %s2659_s6 }
 0x78e   : > { %1459 = vrot.lane.b32.xlu1 %v2857_v37, %s2660_s19 }
 0x792   : > { %1509 = vrot.lane.b32.xlu1 %v2860_v40, %s2660_s19 }
 0x796   : > { %1507 = vrot.lane.b32.xlu1 %v2860_v40, %s2661_s26 }
 0x7fa   : > { %v1339_v52 = vpop.xlane.xlu0 %1338 }
 0x7fb   : > { %v1343_v53 = vsub.f32 %v1335_v35, %v1339_v52 }
 0x7fd   : > { %v1345_v54 = vmul.f32 1.442695, %v1343_v53 }
 0x7ff   : > { %2599 = vpow2.f32 %v1345_v54 }
 0x802   : > { %v1342_v55 = vpop.xlane.xlu1 %1341 }
 0x803   : > { %v1344_v56 = vsub.f32 %v1336_v47, %v1342_v55 }
 0x805   : > { %v1347_v57 = vmul.f32 1.442695, %v1344_v56 }
 0x806   : > { %v1410_v58 = vpop.permute.xlu1 %1409 }
 0x807   : > { %2601 = vpow2.f32 %v1347_v57  ;;  %v1415_v59 = vsel %vm917_vm4, %v1410_v58, 0 }
 0x808   : > { %2444 = vmatpush3.bf16.msra.mxu0 %v1415_v59 }
 0x809   : > { %2455 = vmatprep.subr.bf16.mxu0 %v2649_v17 }
 0x80a   : > { %v1460_v8 = vpop.permute.xlu1 %1459 }
 0x80b   : > { %v1465_v10 = vsel %vm788_vm2, %v1460_v8, 0 }
 0x80c   : > { %v2600_v60 = vpop.eup %2599 }
 0x80d   : > { %v1349_v61 = vsel %vm788_vm2, %v2600_v60, 0.0 }
 0x80e   : > { %1350 = vadd.xlane.f32.xlu0 %v1349_v61  ;;  %v1510_v13 = vpop.permute.xlu1 %1509 }
 0x80f   : > { %v1515_v16 = vsel %vm788_vm2, %v1510_v13, 0 }
 0x812   : > { %v1508_v18 = vpop.permute.xlu1 %1507 }
 0x814   : > { %v2602_v62 = vpop.eup %2601 }
 0x815   : > { %v1352_v63 = vsel %vm788_vm2, %v2602_v62, 0.0 }
 0x816   : > { %1353 = vadd.xlane.f32.xlu0 %v1352_v63 }
 0x82c   : > { %1361 = vrot.lane.b32.xlu0 %v2857_v37, %s2659_s6 }
 0x830   : > { %1457 = vrot.lane.b32.xlu0 %v2857_v37, %s2661_s26 }
 0x897   : > { %v1351_v0 = vpop.xlane.xlu0 %1350 }
 0x898   : > { %2603 = vrcp.f32 %v1351_v0 }
 0x89f   : > { %v1354_v1 = vpop.xlane.xlu0 %1353 }
 0x8a0   : > { %2605 = vrcp.f32 %v1354_v1 }
 0x8a3   : > { %v1362_v4 = vpop.permute.xlu0 %1361 }
 0x8a4   : > { %v1367_v5 = vsel %vm917_vm4, %v1362_v4, 0  ;;  %v2567_v4 = vld [vmem:[%s2786_s15 + $0x8] sm:$0xff]  }
 0x8a5   : > { %v2604_v6 = vpop.eup %2603  ;;  %2438 = vmatpush3.bf16.msra.mxu1 %v1367_v5  ;;  %v2568_v5 = vld [vmem:[%s2786_s15] sm:$0xff]  }
 0x8a6   : > { %2449 = vmatprep.subr.bf16.mxu1 %v2649_v17  ;;  %v1357_v7 = vmul.f32 %v2604_v6, %v2600_v60 }
 0x8a7   : > { %v1458_v15 = vpop.permute.xlu0 %1457 }
 0x8a8   : > { %v1359_v9 = vpack.c.bf16 %v1357_v7, %v1357_v7 }
 0x8aa   : > { %2440 = vmatmul.mubr.msk.bf16.vlgmr.msra.gmra.mxu1 %vm788_vm2, %v1359_v9 }
 0x8ab   : > { %2450 = vmatpush3.bf16.xpose.msra.mxu1 %v1465_v10  ;;  %2451 = vmatprep.mubr.msk.bf16.mxu1 %vm2650_vm1, %v2649_v17 }
 0x8ac   : > { %2461 = vmatprep.subr.bf16.mxu1 %v2649_v17 }
 0x8ad   : > { %v2606_v11 = vpop.eup %2605 }
 0x8ae   : > { %v1358_v12 = vmul.f32 %v2606_v11, %v2602_v62 }
 0x8b0   : > { %v1360_v14 = vpack.c.bf16 %v1358_v12, %v1358_v12 }
 0x8b2   : > { %2446 = vmatmul.mubr.msk.bf16.vlgmr.msra.gmra.mxu0 %vm788_vm2, %v1360_v14  ;;  %2452 = vmatmul.mubr.msk.bf16.vlgmr.msra.gmra.mxu1 %vm788_vm2, %v1458_v15 }
 0x8b3   : > { %2456 = vmatpush3.bf16.xpose.msra.mxu0 %v1515_v16  ;;  %2457 = vmatprep.mubr.msk.bf16.mxu0 %vm2650_vm1, %v2649_v17 }
 0x8b4   : > { %2467 = vmatprep.subr.bf16.mxu0 %v2649_v17  ;;  %2463 = vmatprep.mubr.msk.bf16.mxu1 %vm2650_vm1, %v2649_v17 }
 0x8ba   : > { %2458 = vmatmul.mubr.msk.bf16.vlgmr.msra.gmra.mxu0 %vm788_vm2, %v1508_v18 }
 0x8bb   : > { %2469 = vmatprep.mubr.msk.bf16.mxu0 %vm2650_vm1, %v2649_v17 }
 0x96a   : > { %v1403_v19 = vpop.f32.mrf.mxu1 }
 0x96c   : > { %v2441_v20 = vpop.f32.mrf.mxu1 }
 0x96e   : > { %v1406_v21 = vpop.f32.mrf.mxu1 }
 0x970   : > { %v2442_v22 = vpop.f32.mrf.mxu1 }
 0x972   : > { %v1451_v23 = vpop.f32.mrf.mxu0  ;;  %v1501_v25 = vpop.f32.mrf.mxu1 }
 0x973   : > { %v1557_v26 = vmul.f32 0.17677669, %v1501_v25  ;;  %v2555_v48 = vpack.i.bf16 %v1451_v23, %v1403_v19 }
 0x974   : > { %v2447_v27 = vpop.f32.mrf.mxu0  ;;  %v2453_v29 = vpop.f32.mrf.mxu1 }
 0x975   : > { %v1559_v31 = vadd.f32 %v1557_v26, %v2875_v51 }
 0x976   : > { %v1454_v33 = vpop.f32.mrf.mxu0  ;;  %v1504_v34 = vpop.f32.mrf.mxu1 }
 0x977   : > { %v1561_v35 = vsel %vm788_vm2, %v1559_v31, -inf }
 0x978   : > { %1562 = vmax.xlane.f32.xlu0 %v1561_v35  ;;  %v2448_v38 = vpop.f32.mrf.mxu0  ;;  %v2454_v39 = vpop.f32.mrf.mxu1 }
 0x97a   : > { %v1551_v41 = vpop.f32.mrf.mxu0 }
 0x97b   : > { %v1558_v42 = vmul.f32 0.17677669, %v1551_v41 }
 0x97c   : > { %v2459_v43 = vpop.f32.mrf.mxu0 }
 0x97d   : > { %v1560_v44 = vadd.f32 %v1558_v42, %v2875_v51 }
 0x97e   : > { %v1554_v45 = vpop.f32.mrf.mxu0 }
 0x97f   : > { %v1564_v46 = vsel %vm788_vm2, %v1560_v44, -inf }
 0x980   : > { %1565 = vmax.xlane.f32.xlu1 %v1564_v46  ;;  %v2460_v47 = vpop.f32.mrf.mxu0 }
 0x991   : > { %1633 = vrot.lane.b32.xlu1 %v2860_v40, %s2662_s28 }
 0x995   : > { %2551 = vrot.lane.b32.xlu1 %v2550_v30, %s2663_s18 }
 0x999   : > { %2556 = vrot.lane.b32.xlu1 %v2555_v48, %s2664_s30 }
 0xa01   : > { %v1563_v49 = vpop.xlane.xlu0 %1562 }
 0xa02   : > { %v1567_v50 = vsub.f32 %v1559_v31, %v1563_v49 }
 0xa04   : > { %v1569_v52 = vmul.f32 1.442695, %v1567_v50 }
 0xa06   : > { %2607 = vpow2.f32 %v1569_v52 }
 0xa09   : > { %v1566_v51 = vpop.xlane.xlu1 %1565 }
 0xa0a   : > { %v1568_v53 = vsub.f32 %v1560_v44, %v1566_v51 }
 0xa0c   : > { %v1571_v54 = vmul.f32 1.442695, %v1568_v53 }
 0xa0d   : > { %v1634_v55 = vpop.permute.xlu1 %1633 }
 0xa0e   : > { %2609 = vpow2.f32 %v1571_v54  ;;  %v1639_v56 = vsel %vm917_vm4, %v1634_v55, 0 }
 0xa0f   : > { %2468 = vmatpush3.bf16.msra.mxu0 %v1639_v56  ;;  %v2569_v56 = vld [vmem:[%s2799_s27 + $0x8] sm:$0xff]  }
 0xa10   : > { %2481 = vmatprep.subr.bf16.mxu0 %v2649_v17 }
 0xa11   : > { %v2552_v15 = vpop.permute.xlu1 %2551 }
 0xa12   : > { %v2554_v18 = vunpack.i.h.bf16 %v2552_v15  ;;  %v2553_v19 = vunpack.i.l.bf16 %v2552_v15  ;;  %v2578_v15 = vld [vmem:[%s2813_s21] sm:$0xff]  }
 0xa13   : > { %v2608_v40 = vpop.eup %2607 }
 0xa14   : > { %v1573_v24 = vsel %vm788_vm2, %v2608_v40, 0.0  ;;  %v1706_v23 = vsel %vm788_vm2, %v2911_v36, %v2554_v18  ;;  %v1705_v25 = vsel %vm788_vm2, %v2909_v32, %v2553_v19  ;;  %v2284_v36 = vld [vmem:[%s3133_s20] ss:$0 sm:$0xff] }
 0xa15   : > { %1574 = vadd.xlane.f32.xlu0 %v1573_v24  ;;  %v2557_v16 = vpop.permute.xlu1 %2556  ;;  %v2571_v24 = vld [vmem:[%s2813_s21 + $0x38] sm:$0xff]  }
 0xa16   : > { %v2559_v20 = vunpack.i.h.bf16 %v2557_v16  ;;  %v2558_v21 = vunpack.i.l.bf16 %v2557_v16  ;;  %v2290_v16 = vld [vmem:[%s598_s5] ss:$0 sm:$0xff] }
 0xa18   : > { %v1708_v29 = vsel %vm1707_vm5, %v1705_v25, %v2558_v21  ;;  %v1709_v31 = vsel %vm1707_vm5, %v1706_v23, %v2559_v20 }
 0xa1b   : > { %v2610_v28 = vpop.eup %2609 }
 0xa1c   : > { %v1576_v30 = vsel %vm788_vm2, %v2610_v28, 0.0 }
 0xa1d   : > { %1577 = vadd.xlane.f32.xlu0 %v1576_v30  ;;  %v2573_v30 = vld [vmem:[%s2813_s21 + $0x28] sm:$0xff]  }
 0xa33   : > { %1585 = vrot.lane.b32.xlu0 %v2857_v37, %s2662_s28  ;;  %s3136_s28 = sld [smem:[#allocation10_spill]] (!%p2303_p6) }
 0xa9e   : > { %v1575_v57 = vpop.xlane.xlu0 %1574 }
 0xa9f   : > { %2611 = vrcp.f32 %v1575_v57  ;;  %v2574_v57 = vld [vmem:[%s2813_s21 + $0x20] sm:$0xff]  }
 0xaa6   : > { %v1578_v58 = vpop.xlane.xlu0 %1577 }
 0xaa7   : > { %2613 = vrcp.f32 %v1578_v58  ;;  %v2575_v58 = vld [vmem:[%s2813_s21 + $0x18] sm:$0xff]  }
 0xaaa   : > { %v1586_v59 = vpop.permute.xlu0 %1585 }
 0xaab   : > { %v1591_v60 = vsel %vm917_vm4, %v1586_v59, 0 }
 0xaac   : > { %v2612_v61 = vpop.eup %2611  ;;  %2462 = vmatpush3.bf16.msra.mxu1 %v1591_v60 }
 0xaad   : > { %v1581_v62 = vmul.f32 %v2612_v61, %v2608_v40  ;;  %2473 = vmatprep.subr.bf16.mxu1 %v2649_v17  ;;  %v2570_v40 = vld [vmem:[%s2799_s27] sm:$0xff]  }
 0xaaf   : > { %v1583_v63 = vpack.c.bf16 %v1581_v62, %v1581_v62 }
 0xab1   : > { %2464 = vmatmul.mubr.msk.bf16.vlgmr.msra.gmra.mxu1 %vm788_vm2, %v1583_v63 }
 0xab2   : > { %2477 = vmatprep.mubr.msk.bf16.mxu1 %vm2650_vm1, %v2649_v17  ;;  %2474 = vmatpush3.bf16.msra.mxu1 %v2567_v4  ;;  %v2288_v4 = vld [vmem:[%s3134_s24] ss:$0 sm:$0xff] }
 0xab3   : > { %2475 = vmatprep.subr.bf16.mxu1 %v2649_v17 }
 0xab4   : > { %v2614_v37 = vpop.eup %2613 }
 0xab5   : > { %v1582_v0 = vmul.f32 %v2614_v37, %v2610_v28  ;;  %v2572_v28 = vld [vmem:[%s2813_s21 + $0x30] sm:$0xff]  }
 0xab6   : > { %2476 = vmatpush3.bf16.msra.mxu1 %v2568_v5 }
 0xab7   : > { %v1584_v1 = vpack.c.bf16 %v1582_v0, %v1582_v0  ;;  %2489 = vmatprep.subr.bf16.mxu1 %v2649_v17 }
 0xab9   : > { %2470 = vmatmul.mubr.msk.bf16.vlgmr.msra.gmra.mxu0 %vm788_vm2, %v1584_v1 }
 0xaba   : > { %2485 = vmatprep.mubr.msk.bf16.mxu0 %vm2650_vm1, %v2649_v17  ;;  %2482 = vmatpush3.bf16.msra.mxu0 %v2569_v56 }
 0xabb   : > { %2483 = vmatprep.subr.bf16.mxu0 %v2649_v17 }
 0xabe   : > { %2484 = vmatpush3.bf16.msra.mxu0 %v2570_v40 }
 0xb71   : > { %v1627_v6 = vpop.f32.mrf.mxu1 }
 0xb73   : > { %v2465_v7 = vpop.f32.mrf.mxu1 }
 0xb75   : > { %v1630_v8 = vpop.f32.mrf.mxu1 }
 0xb76   : > { %v2289_v8 = vld [vmem:[%s590_s2] ss:$0 sm:$0xff] }
 0xb77   : > { %v2466_v9 = vpop.f32.mrf.mxu1 }
 0xb79   : > { %v1675_v10 = vpop.f32.mrf.mxu0 }
 0xb7a   : > { %v2560_v11 = vpack.i.bf16 %v1675_v10, %v1627_v6 }
 0xb7b   : > { %v2471_v12 = vpop.f32.mrf.mxu0 }
 0xb7c   : > { %2561 = vrot.lane.b32.xlu0 %v2560_v11, %s2665_s16  ;;  %s3137_s16 = sld [smem:[#allocation13_spill]] (!%p2303_p6) }
 0xb7d   : > { %v1678_v13 = vpop.f32.mrf.mxu0 }
 0xb7e   : > { %v2576_v13 = vld [vmem:[%s2813_s21 + $0x10] sm:$0xff]  }
 0xb7f   : > { %v2472_v14 = vpop.f32.mrf.mxu0 }
 0xb80   : > { %v2577_v14 = vld [vmem:[%s2813_s21 + $0x8] sm:$0xff]  }
 0xbee   : > { %v2562_v22 = vpop.permute.xlu0 %2561 }
 0xbef   : > { %v2564_v26 = vunpack.i.h.bf16 %v2562_v22  ;;  %v2563_v27 = vunpack.i.l.bf16 %v2562_v22 }
 0xbf1   : > { %v1712_v33 = vsel %vm1710_vm6, %v1709_v31, %v2564_v26  ;;  %v1711_v34 = vsel %vm1710_vm6, %v1708_v29, %v2563_v27 }
 0xbf2   : > { %v1713_v35 = vpack.c.bf16 %v1712_v33, %v1711_v34 }
 0xbf4   : > { %2478 = vmatmul.mubr.msk.bf16.vlgmr.msra.gmra.mxu1 %vm678_vm0, %v1713_v35 }
 0xbf5   : > { %2505 = vmatprep.mubr.msk.bf16.mxu1 %vm2650_vm1, %v2649_v17  ;;  %2490 = vmatpush3.bf16.msra.mxu1 %v2571_v24 }
 0xbf6   : > { %2491 = vmatprep.subr.bf16.mxu1 %v2649_v17 }
 0xbf9   : > { %2492 = vmatpush3.bf16.msra.mxu1 %v2572_v28 }
 0xbfa   : > { %2493 = vmatprep.subr.bf16.mxu1 %v2649_v17 }
 0xbfd   : > { %2494 = vmatpush3.bf16.msra.mxu1 %v2573_v30 }
 0xbfe   : > { %2495 = vmatprep.subr.bf16.mxu1 %v2649_v17 }
 0xc01   : > { %2496 = vmatpush3.bf16.msra.mxu1 %v2574_v57 }
 0xc02   : > { %2497 = vmatprep.subr.bf16.mxu1 %v2649_v17 }
 0xc05   : > { %2498 = vmatpush3.bf16.msra.mxu1 %v2575_v58 }
 0xc06   : > { %2499 = vmatprep.subr.bf16.mxu1 %v2649_v17 }
 0xc09   : > { %2500 = vmatpush3.bf16.msra.mxu1 %v2576_v13 }
 0xc0a   : > { %2501 = vmatprep.subr.bf16.mxu1 %v2649_v17 }
 0xc0d   : > { %2502 = vmatpush3.bf16.msra.mxu1 %v2577_v14 }
 0xc0e   : > { %2503 = vmatprep.subr.bf16.mxu1 %v2649_v17  ;;  %v2294_v17 = vld [vmem:[%s606_s1] ss:$0 sm:$0xff] }
 0xc11   : > { %2504 = vmatpush3.bf16.msra.mxu1 %v2578_v15 }
 0xcb4   : > { %v1774_v38 = vpop.f32.mrf.mxu1 }
 0xcb5   : > { %v1775_v39 = vadd.f32 %v2284_v36, %v1774_v38 }
 0xcb6   : > { %v2479_v32 = vpop.f32.mrf.mxu1 }
 0xcb7   : > { %v3021_v41 = vadd.f32 %v1775_v39, %v2822_v2 }
 0xcb8   : > { %v1777_v42 = vpop.f32.mrf.mxu1 }
 0xcb9   : > { %v1778_v43 = vadd.f32 %v2284_v36, %v1777_v42  ;;  %v1785_v44 = vsel %vm678_vm0, %v3021_v41, 0.0 }
 0xcba   : > { %1786 = vadd.xlane.f32.xlu1 %v1785_v44  ;;  %v2480_v45 = vpop.f32.mrf.mxu1 }
 0xcbb   : > { %v3026_v46 = vadd.f32 %v1778_v43, %v2824_v3 }
 0xcbd   : > { %v1788_v47 = vsel %vm678_vm0, %v3026_v46, 0.0 }
 0xcbe   : > { %1789 = vadd.xlane.f32.xlu0 %v1788_v47 }
 0xd43   : > { %v1787_v48 = vpop.xlane.xlu1 %1786 }
 0xd44   : > { %v1791_v49 = vmul.f32 0.03125, %v1787_v48 }
 0xd46   : > { %v1793_v2 = vsub.f32 %v3021_v41, %v1791_v49 }
 0xd47   : > { %v1790_v50 = vpop.xlane.xlu0 %1789 }
 0xd48   : > { %v1792_v52 = vmul.f32 0.03125, %v1790_v50  ;;  %v1795_v51 = vmul.f32 %v1793_v2, %v1793_v2 }
 0xd4a   : > { %v1794_v53 = vsub.f32 %v3026_v46, %v1792_v52  ;;  %v1797_v3 = vsel %vm678_vm0, %v1795_v51, 0.0 }
 0xd4b   : > { %1798 = vadd.xlane.f32.xlu0 %v1797_v3 }
 0xd4c   : > { %v1796_v54 = vmul.f32 %v1794_v53, %v1794_v53 }
 0xd4e   : > { %v1800_v55 = vsel %vm678_vm0, %v1796_v54, 0.0 }
 0xd4f   : > { %1801 = vadd.xlane.f32.xlu0 %v1800_v55 }
 0xdd4   : > { %v1799_v59 = vpop.xlane.xlu0 %1798 }
 0xdd5   : > { %v1803_v60 = vmul.f32 0.03125, %v1799_v59 }
 0xdd7   : > { %v1805_v61 = vadd.f32 1e-05, %v1803_v60 }
 0xdd8   : > { %v1802_v62 = vpop.xlane.xlu0 %1801 }
 0xdd9   : > { %2615 = vrsqrt.f32 %v1805_v61  ;;  %v1804_v63 = vmul.f32 0.03125, %v1802_v62 }
 0xddb   : > { %v1806_v37 = vadd.f32 1e-05, %v1804_v63 }
 0xddd   : > { %2617 = vrsqrt.f32 %v1806_v37 }
 0xde6   : > { %v2616_v0 = vpop.eup %2615 }
 0xde7   : > { %v1809_v1 = vmul.f32 %v2616_v0, %v1793_v2 }
 0xde9   : > { %v1817_v7 = vmul.f32 %v2288_v4, %v1809_v1 }
 0xdea   : > { %v2618_v5 = vpop.eup %2617 }
 0xdeb   : > { %v1810_v6 = vmul.f32 %v2618_v5, %v1794_v53  ;;  %v1825_v10 = vadd.f32 %v2289_v8, %v1817_v7 }
 0xded   : > { %v1818_v9 = vmul.f32 %v2288_v4, %v1810_v6 }
 0xdef   : > { %v1826_v11 = vadd.f32 %v2289_v8, %v1818_v9 }
 0xdf1   : > { %v1827_v12 = vpack.c.bf16 %v1826_v11, %v1825_v10 }
 0xdf3   : > { %2486 = vmatmul.mubr.msk.bf16.vlgmr.msra.gmra.mxu0 %vm678_vm0, %v1827_v12 }
 0xeb3   : > { %v1888_v18 = vpop.f32.mrf.mxu0 }
 0xeb4   : > { %v1889_v20 = vadd.f32 %v2290_v16, %v1888_v18 }
 0xeb5   : > { %v2487_v19 = vpop.f32.mrf.mxu0 }
 0xeb6   : > { %v1895_v25 = vmax.f32 %v1889_v20, 0.0 }
 0xeb7   : > { %v1891_v21 = vpop.f32.mrf.mxu0 }
 0xeb8   : > { %v1892_v22 = vadd.f32 %v2290_v16, %v1891_v21 }
 0xeb9   : > { %v2488_v23 = vpop.f32.mrf.mxu0 }
 0xeba   : > { %v1896_v26 = vmax.f32 %v1892_v22, 0.0 }
 0xebc   : > { %v1897_v27 = vpack.c.bf16 %v1896_v26, %v1895_v25 }
 0xebe   : > { %2506 = vmatmul.mubr.bf16.vlgmr.msra.gmra.mxu1 %v1897_v27 }
 0xf7e   : > { %v2003_v29 = vpop.f32.mrf.mxu1 }
 0xf7f   : > { %v2004_v31 = vadd.f32 %v2294_v17, %v2003_v29 }
 0xf80   : > { %v2507_v33 = vpop.f32.mrf.mxu1 }
 0xf81   : > { %v2010_v34 = vadd.f32 %v2004_v31, %v3021_v41 }
 0xf82   : > { %v2006_v35 = vpop.f32.mrf.mxu1 }
 0xf83   : > { %2012 = vst.msk [vmem:[#allocation2] sm:$0xff] %vm678_vm0, %v2010_v34  ;;  %v2007_v36 = vadd.f32 %v2294_v17, %v2006_v35  ;;  %2017 = sbr.rel (%p2303_p6) target bundleno = 4291 (0x10c3), region = 114 }
 0xf84   : > { %v2508_v38 = vpop.f32.mrf.mxu1 }
 0xf85   : > { %v2011_v39 = vadd.f32 %v2007_v36, %v3026_v46 }
 0xf87   : > { %2013 = vst.msk [vmem:[#allocation2 + $0x8] sm:$0xff] %vm678_vm0, %v2011_v39 }
 0xf88   : > { %v2020_v32 = vsel %vm678_vm0, %v2010_v34, 0.0  ;;  %v2023_v42 = vsel %vm678_vm0, %v2011_v39, 0.0  ;;  %v2304_v40 = vld [vmem:[%s3135_s29] ss:$0 sm:$0xff]  ;;  %vm2070_vm7 = vcmask 257024  }
 0xf89   : > { %2021 = vadd.xlane.f32.xlu0 %v2020_v32  ;;  %v2305_v28 = vld [vmem:[%s3136_s28] ss:$0 sm:$0xff] }
 0xf8d   : > { %2024 = vadd.xlane.f32.xlu0 %v2023_v42 }
0x1012   : > { %v2022_v43 = vpop.xlane.xlu0 %2021 }
0x1013   : > { %v2026_v41 = vmul.f32 0.03125, %v2022_v43 }
0x1015   : > { %v2028_v44 = vsub.f32 %v2010_v34, %v2026_v41 }
0x1016   : > { %v2025_v45 = vpop.xlane.xlu0 %2024 }
0x1017   : > { %v2027_v47 = vmul.f32 0.03125, %v2025_v45  ;;  %v2030_v48 = vmul.f32 %v2028_v44, %v2028_v44 }
0x1019   : > { %v2029_v49 = vsub.f32 %v2011_v39, %v2027_v47  ;;  %v2032_v46 = vsel %vm678_vm0, %v2030_v48, 0.0 }
0x101a   : > { %2033 = vadd.xlane.f32.xlu1 %v2032_v46 }
0x101b   : > { %v2031_v2 = vmul.f32 %v2029_v49, %v2029_v49 }
0x101d   : > { %v2035_v50 = vsel %vm678_vm0, %v2031_v2, 0.0 }
0x101e   : > { %2036 = vadd.xlane.f32.xlu1 %v2035_v50 }
0x10a3   : > { %v2034_v52 = vpop.xlane.xlu1 %2033 }
0x10a4   : > { %v2038_v51 = vmul.f32 0.03125, %v2034_v52 }
0x10a6   : > { %v2040_v53 = vadd.f32 1e-05, %v2038_v51 }
0x10a7   : > { %v2037_v3 = vpop.xlane.xlu1 %2036 }
0x10a8   : > { %2619 = vrsqrt.f32 %v2040_v53  ;;  %v2039_v54 = vmul.f32 0.03125, %v2037_v3 }
0x10aa   : > { %v2041_v55 = vadd.f32 1e-05, %v2039_v54 }
0x10ac   : > { %2621 = vrsqrt.f32 %v2041_v55 }
0x10b5   : > { %v2620_v56 = vpop.eup %2619 }
0x10b6   : > { %v2044_v24 = vmul.f32 %v2620_v56, %v2028_v44 }
0x10b8   : > { %v2052_v30 = vmul.f32 %v2304_v40, %v2044_v24 }
0x10b9   : > { %v2622_v57 = vpop.eup %2621 }
0x10ba   : > { %v2060_v58 = vadd.f32 %v2305_v28, %v2052_v30  ;;  %v2045_v59 = vmul.f32 %v2622_v57, %v2029_v49 }
0x10bc   : > { %v2317_v60 = vpack.c.bf16 %v2060_v58, %v2060_v58  ;;  %v2053_v61 = vmul.f32 %v2304_v40, %v2045_v59 }
0x10be   : > { %2071 = vst.msk [vmem:[%s3137_s16] sm:$0xf] %vm2070_vm7, %v2317_v60  ;;  %v2061_v62 = vadd.f32 %v2305_v28, %v2053_v61 }
0x10c0   : > { %v2318_v63 = vpack.c.bf16 %v2061_v62, %v2061_v62 }
0x10c2   : > { %2072 = vst.msk [vmem:[%s3137_s16 + $0x4] sm:$0xf] %vm2070_vm7, %v2318_v63 }
0x10c3 PF: > { %s3138_s20 = sld [smem:[#allocation7_spill]] }
0x10c4   : > { %s3139_s29 = sld [smem:[#allocation6_spill]] }
0x10c5   : > { %s3140_s30 = sld [smem:[#allocation8_spill]] }
0x10c9   : > { %s24_s15 = sadd.s32 1, %s3138_s20  }
0x10ca   : > { %p21_p7 = scmp.ge.s32.totalorder %s24_s15, 4  }
0x10cc   :  { %23 = sbr.rel (!%p21_p7) target bundleno = 6 (0x6), region = 183 }
0x10d1   :  { %2095 = vsyncmov [#allocation3] }
0x10d4   :  { %s2096_s27 = vpop.sfrf %2095 }
0x10d5   :  { %p2312_p8 = scmp.ne.s32.totalorder %s2096_s27, 0 }
0x10d7   :  { %2100 = shalt.err (%p2312_p8)  }

</bundles_post_ra>
